<compile_context>
chip_gen: v5e
topology: v5e:2x2
jax: 0.10.0
libtpu: 0.0.40
codegen_flags: <defaults>
</compile_context>

<pallas_src>
import numpy as np
import jax
import jax.numpy as jnp
from jax import lax
from jax.experimental import pallas as pl
from jax.experimental.pallas import tpu as pltpu


# ----------------------------------------------------------------------------
# Anchor helpers (pure NumPy glue, identical semantics to the PyTorch module)
# ----------------------------------------------------------------------------
def generate_anchor_base(base_size=16, ratios=(0.5, 1, 2), anchor_scales=(8, 16, 32)):
    py = base_size / 2.0
    px = base_size / 2.0
    anchor_base = np.zeros((len(ratios) * len(anchor_scales), 4), dtype=np.float32)
    for i in range(len(ratios)):
        for j in range(len(anchor_scales)):
            h = base_size * anchor_scales[j] * np.sqrt(ratios[i])
            w = base_size * anchor_scales[j] * np.sqrt(1.0 / ratios[i])
            idx = i * len(anchor_scales) + j
            anchor_base[idx, 0] = py - h / 2.0
            anchor_base[idx, 1] = px - w / 2.0
            anchor_base[idx, 2] = py + h / 2.0
            anchor_base[idx, 3] = px + w / 2.0
    return anchor_base


def _enumerate_shifted_anchor(anchor_base, feat_stride, height, width):
    shift_y = np.arange(0, height * feat_stride, feat_stride)
    shift_x = np.arange(0, width * feat_stride, feat_stride)
    shift_x, shift_y = np.meshgrid(shift_x, shift_y)
    shift = np.stack(
        (shift_y.ravel(), shift_x.ravel(), shift_y.ravel(), shift_x.ravel()), axis=1
    )
    A = anchor_base.shape[0]
    K = shift.shape[0]
    anchor = anchor_base.reshape((1, A, 4)) + shift.reshape((1, K, 4)).transpose((1, 0, 2))
    anchor = anchor.reshape((K * A, 4)).astype(np.float32)
    return anchor


# ----------------------------------------------------------------------------
# Pallas kernel: one grid step == one row strip of the flattened (N*H*W) axis
# ----------------------------------------------------------------------------
def _make_rpn_kernel(fg_start, fg_len):
    def rpn_kernel(xcol_ref, w1_ref, b1_ref, wh_ref, bh_ref, out_ref):
        # conv1 as one big-K matmul (im2col done in the wrapper), f32 accum.
        h = jnp.dot(xcol_ref[...], w1_ref[...], preferred_element_type=jnp.float32)
        h = jnp.maximum(h + b1_ref[...], 0.0)                 # bias + ReLU in f32

        # Single fused head matmul: [loc | score | (s1 - s0)] padded to 128 lanes.
        h = h.astype(wh_ref.dtype)                            # bf16 MXU path if requested
        head = jnp.dot(h, wh_ref[...], preferred_element_type=jnp.float32) + bh_ref[...]

        # Foreground probability: softmax over the 2-class axis keeps class 1,
        # which equals sigmoid(s1 - s0); the diff is already a head column set.
        col = lax.broadcasted_iota(jnp.int32, head.shape, 1)
        is_fg = (col >= fg_start) & (col < fg_start + fg_len)
        out_ref[...] = jnp.where(is_fg, jax.nn.sigmoid(head), head)

    return rpn_kernel


def _pick_tile_m(m, max_tile=512):
    """Largest multiple-of-8 divisor of m (<= max_tile); prefer >=2 grid steps."""
    fallback = None
    for tm in (512, 256, 128, 64, 32, 16, 8):
        if tm <= max_tile and m % tm == 0:
            if m // tm >= 2:
                return tm
            fallback = fallback or tm
    return fallback or m


# ----------------------------------------------------------------------------
# Wrapper (layout transposes, im2col, weight packing, anchor enumeration)
# ----------------------------------------------------------------------------
def pack_params(torch_weights, compute_dtype=jnp.bfloat16):
    """Repack PyTorch-layout conv weights into the fused kernel layout."""
    w1_t, b1_t, wloc_t, bloc_t, wsc_t, bsc_t = torch_weights
    cmid, cin = w1_t.shape[0], w1_t.shape[1]

    # conv1: (out, in, kh, kw) -> (kh*kw*in, out) matching wrapper im2col order.
    w1 = jnp.transpose(w1_t, (2, 3, 1, 0)).reshape(9 * cin, cmid).astype(compute_dtype)
    b1 = b1_t.reshape(1, cmid).astype(jnp.float32)

    # 1x1 heads: (out, in, 1, 1) -> (cmid, out); fold fg-score diff into W_head.
    wloc = jnp.transpose(wloc_t[:, :, 0, 0], (1, 0))          # (cmid, 4A)
    wsc = jnp.transpose(wsc_t[:, :, 0, 0], (1, 0))            # (cmid, 2A)
    wdiff = wsc[:, 1::2] - wsc[:, 0::2]                       # (cmid, A)
    bdiff = bsc_t[1::2] - bsc_t[0::2]

    w_head = jnp.concatenate([wloc, wsc, wdiff], axis=1)      # (cmid, 7A)
    b_head = jnp.concatenate([bloc_t, bsc_t, bdiff])          # (7A,)
    head_w = w_head.shape[1]
    headp = max(128, ((head_w + 127) // 128) * 128)           # pad to lane-dense width
    w_head = jnp.pad(w_head, ((0, 0), (0, headp - head_w))).astype(compute_dtype)
    b_head = jnp.pad(b_head, (0, headp - head_w)).reshape(1, headp).astype(jnp.float32)
    return (w1, b1, w_head, b_head)


def rpn_forward(x_nchw, packed_params, anchor_base, feat_stride, img_size,
                scale=1.0, tile_m=None):
    w1, b1, w_head, b_head = packed_params
    n, c, hh, ww = x_nchw.shape
    A = int(anchor_base.shape[0])
    k1, cmid = w1.shape
    headp = w_head.shape[1]
    compute_dtype = w1.dtype

    # im2col in the wrapper (recommended for small Cin; for large Cin do
    # tap-grouped accumulation inside the kernel instead of inflating HBM 9x).
    x = jnp.transpose(x_nchw, (0, 2, 3, 1)).astype(compute_dtype)   # NCHW -> NHWC
    x_pad = jnp.pad(x, ((0, 0), (1, 1), (1, 1), (0, 0)))
    taps = [x_pad[:, dy:dy + hh, dx:dx + ww, :] for dy in range(3) for dx in range(3)]
    x_col = jnp.concatenate(taps, axis=-1).reshape(n * hh * ww, 9 * c)

    M = n * hh * ww
    tm = tile_m or _pick_tile_m(M)
    grid = (M // tm,)

    in_specs = [
        pl.BlockSpec((tm, k1), lambda i: (i, 0)),          # activation row strip
        pl.BlockSpec((k1, cmid), lambda i: (0, 0)),        # conv1 weights (grid-invariant)
        pl.BlockSpec((1, cmid), lambda i: (0, 0)),         # conv1 bias
        pl.BlockSpec((cmid, headp), lambda i: (0, 0)),     # fused head weights
        pl.BlockSpec((1, headp), lambda i: (0, 0)),        # fused head bias
    ]
    out_specs = pl.BlockSpec((tm, headp), lambda i: (i, 0))

    out = pl.pallas_call(
        _make_rpn_kernel(fg_start=6 * A, fg_len=A),
        out_shape=jax.ShapeDtypeStruct((M, headp), jnp.float32),
        grid=grid,
        in_specs=in_specs,
        out_specs=out_specs,
        compiler_params=pltpu.CompilerParams(
            dimension_semantics=("parallel",),
            vmem_limit_bytes=32 * 1024 * 1024,
        ),
    )(x_col, w1, b1, w_head, b_head)

    # Split the fused lane-dense output; channel-last ordering matches the
    # PyTorch permute(0,2,3,1).view(...) reshapes exactly.
    out3 = out.reshape(n, hh * ww, headp)
    rpn_locs = out3[:, :, : 4 * A].reshape(n, hh * ww * A, 4)
    rpn_scores = out3[:, :, 4 * A: 6 * A].reshape(n, hh * ww * A, 2)
    rpn_fg_scores = out3[:, :, 6 * A: 7 * A].reshape(n, -1)

    anchor = _enumerate_shifted_anchor(np.asarray(anchor_base), feat_stride, hh, ww)

    # TODO(synk): ProposalCreator (loc2bbox decode + clip + score sort + NMS)
    # produces a data-dependent, variable-size set of proposals; no clean
    # Pallas equivalent, so rois / roi_indices are returned empty.
    rois = np.zeros((0, 4), dtype=np.float32)
    roi_indices = np.zeros((0,), dtype=np.int32)

    return rpn_locs, rpn_scores, rois, roi_indices, anchor, rpn_fg_scores


# ----------------------------------------------------------------------------
# Deterministic parameter construction (mirrors normal_init(mean=0, std=0.01))
# ----------------------------------------------------------------------------
def make_torch_weights(key, in_channels, mid_channels, n_anchor):
    k1, k2, k3 = jax.random.split(key, 3)
    w1_t = 0.01 * jax.random.normal(k1, (mid_channels, in_channels, 3, 3), jnp.float32)
    wloc_t = 0.01 * jax.random.normal(k2, (n_anchor * 4, mid_channels, 1, 1), jnp.float32)
    wsc_t = 0.01 * jax.random.normal(k3, (n_anchor * 2, mid_channels, 1, 1), jnp.float32)
    b1_t = jnp.zeros((mid_channels,), jnp.float32)
    bloc_t = jnp.zeros((n_anchor * 4,), jnp.float32)
    bsc_t = jnp.zeros((n_anchor * 2,), jnp.float32)
    return (w1_t, b1_t, wloc_t, bloc_t, wsc_t, bsc_t)


# ----------------------------------------------------------------------------
# Pure-JAX reference (for a correctness check of the kernel path)
# ----------------------------------------------------------------------------
def reference_forward(x_nchw, torch_weights, n_anchor):
    w1_t, b1_t, wloc_t, bloc_t, wsc_t, bsc_t = torch_weights
    x = jnp.transpose(x_nchw, (0, 2, 3, 1))                     # NHWC
    w_hwio = jnp.transpose(w1_t, (2, 3, 1, 0))                  # HWIO
    h = lax.conv_general_dilated(
        x, w_hwio, window_strides=(1, 1), padding="SAME",
        dimension_numbers=("NHWC", "HWIO", "NHWC")) + b1_t
    h = jnp.maximum(h, 0.0)
    n, hh, ww, cmid = h.shape
    hf = h.reshape(n, hh * ww, cmid)
    loc = hf @ jnp.transpose(wloc_t[:, :, 0, 0], (1, 0)) + bloc_t
    sc = hf @ jnp.transpose(wsc_t[:, :, 0, 0], (1, 0)) + bsc_t
    rpn_locs = loc.reshape(n, hh * ww * n_anchor, 4)
    rpn_scores = sc.reshape(n, hh * ww * n_anchor, 2)
    fg = jax.nn.softmax(sc.reshape(n, hh * ww, n_anchor, 2), axis=-1)[..., 1]
    return rpn_locs, rpn_scores, fg.reshape(n, -1)


if __name__ == "__main__":
    # Small, forward-consistent shapes: N=2, Cin=32, Cmid=128, H=W=16, A=9.
    batch, in_channels, mid_channels = 2, 32, 128
    hh = ww = 16
    feat_stride = 16
    anchor_base = generate_anchor_base()
    n_anchor = anchor_base.shape[0]        # 9
    img_size = (hh * feat_stride, ww * feat_stride)

    key = jax.random.PRNGKey(0)
    kx, kp = jax.random.split(key)
    x = jax.random.normal(kx, (batch, in_channels, hh, ww), jnp.float32)
    torch_weights = make_torch_weights(kp, in_channels, mid_channels, n_anchor)

    ref_locs, ref_scores, ref_fg = reference_forward(x, torch_weights, n_anchor)

    # --- bf16 compute path (recommended for v6e/v7x; f32 accumulation) ------
    params_bf16 = pack_params(torch_weights, jnp.bfloat16)
    rpn_locs, rpn_scores, rois, roi_indices, anchor, rpn_fg = rpn_forward(
        x, params_bf16, anchor_base, feat_stride, img_size, scale=1.0)
    jax.block_until_ready((rpn_locs, rpn_scores, rpn_fg))

    assert rpn_locs.shape == (batch, hh * ww * n_anchor, 4)
    assert rpn_scores.shape == (batch, hh * ww * n_anchor, 2)
    assert rpn_fg.shape == (batch, hh * ww * n_anchor)
    assert anchor.shape == (hh * ww * n_anchor, 4)
    assert jnp.allclose(rpn_locs, ref_locs, rtol=2e-2, atol=2e-3)
    assert jnp.allclose(rpn_scores, ref_scores, rtol=2e-2, atol=2e-3)
    assert jnp.allclose(rpn_fg, ref_fg, rtol=2e-2, atol=2e-3)

    # --- f32 compute path (tight exactness check; default choice on v5e) ----
    params_f32 = pack_params(torch_weights, jnp.float32)
    locs32, scores32, _, _, _, fg32 = rpn_forward(
        x, params_f32, anchor_base, feat_stride, img_size, scale=1.0)
    jax.block_until_ready((locs32, scores32, fg32))
    assert jnp.allclose(locs32, ref_locs, rtol=1e-4, atol=1e-4)
    assert jnp.allclose(scores32, ref_scores, rtol=1e-4, atol=1e-4)
    assert jnp.allclose(fg32, ref_fg, rtol=1e-4, atol=1e-4)

    print("KERNEL_OK")
</pallas_src>

<mosaic_0001>
module attributes {stable_mosaic.version = 11 : i64} {
  func.func @rpn_kernel(%arg0: i32, %arg1: memref<256x288xbf16, #tpu.memory_space<vmem>>, %arg2: memref<288x128xbf16, #tpu.memory_space<vmem>>, %arg3: memref<1x128xf32, #tpu.memory_space<vmem>>, %arg4: memref<128x128xbf16, #tpu.memory_space<vmem>>, %arg5: memref<1x128xf32, #tpu.memory_space<vmem>>, %arg6: memref<256x128xf32, #tpu.memory_space<vmem>>) attributes {dimension_semantics = [#tpu.dimension_semantics<parallel>], iteration_bounds = array<i64: 2>, scalar_prefetch = 0 : i64, scratch_operands = 0 : i64, tpu.core_type = #tpu.core_type<tc>, window_params = [{transform_indices = @transform_0, window_bounds = array<i64: 256, 288>}, {pipeline_mode = #tpu.pipeline_mode<synchronous>, transform_indices = @transform_1, window_bounds = array<i64: 288, 128>}, {pipeline_mode = #tpu.pipeline_mode<synchronous>, transform_indices = @transform_2, window_bounds = array<i64: 1, 128>}, {pipeline_mode = #tpu.pipeline_mode<synchronous>, transform_indices = @transform_3, window_bounds = array<i64: 128, 128>}, {pipeline_mode = #tpu.pipeline_mode<synchronous>, transform_indices = @transform_4, window_bounds = array<i64: 1, 128>}, {transform_indices = @transform_5, window_bounds = array<i64: 256, 128>}]} {
    %c0 = arith.constant 0 : index
    %c0_0 = arith.constant 0 : index
    %0 = vector.load %arg1[%c0, %c0_0] : memref<256x288xbf16, #tpu.memory_space<vmem>>, vector<256x288xbf16>
    %c0_1 = arith.constant 0 : index
    %c0_2 = arith.constant 0 : index
    %1 = vector.load %arg2[%c0_1, %c0_2] : memref<288x128xbf16, #tpu.memory_space<vmem>>, vector<288x128xbf16>
    %cst = arith.constant dense<0.000000e+00> : vector<256x128xf32>
    %2 = tpu.matmul %0, %1, %cst {dimension_numbers = #tpu.dot_dimension_numbers<[1], [0], [0], [1], [0, 0, 1, 1], [], []>} : vector<256x288xbf16>, vector<288x128xbf16>, vector<256x128xf32> -> vector<256x128xf32>
    %c0_3 = arith.constant 0 : index
    %c0_4 = arith.constant 0 : index
    %3 = vector.load %arg3[%c0_3, %c0_4] : memref<1x128xf32, #tpu.memory_space<vmem>>, vector<1x128xf32>
    %4 = vector.broadcast %3 : vector<1x128xf32> to vector<256x128xf32>
    %5 = arith.addf %2, %4 : vector<256x128xf32>
    %cst_5 = arith.constant 0.000000e+00 : f32
    %6 = vector.broadcast %cst_5 : f32 to vector<256x128xf32>
    %7 = arith.maximumf %5, %6 : vector<256x128xf32>
    %8 = arith.truncf %7 : vector<256x128xf32> to vector<256x128xbf16>
    %c0_6 = arith.constant 0 : index
    %c0_7 = arith.constant 0 : index
    %9 = vector.load %arg4[%c0_6, %c0_7] : memref<128x128xbf16, #tpu.memory_space<vmem>>, vector<128x128xbf16>
    %cst_8 = arith.constant dense<0.000000e+00> : vector<256x128xf32>
    %10 = tpu.matmul %8, %9, %cst_8 {dimension_numbers = #tpu.dot_dimension_numbers<[1], [0], [0], [1], [0, 0, 1, 1], [], []>} : vector<256x128xbf16>, vector<128x128xbf16>, vector<256x128xf32> -> vector<256x128xf32>
    %c0_9 = arith.constant 0 : index
    %c0_10 = arith.constant 0 : index
    %11 = vector.load %arg5[%c0_9, %c0_10] : memref<1x128xf32, #tpu.memory_space<vmem>>, vector<1x128xf32>
    %12 = vector.broadcast %11 : vector<1x128xf32> to vector<256x128xf32>
    %13 = arith.addf %10, %12 : vector<256x128xf32>
    %14 = tpu.iota {dimensions = array<i32: 1>} : vector<256x128xi32>
    %c54_i32 = arith.constant 54 : i32
    %15 = vector.broadcast %c54_i32 : i32 to vector<256x128xi32>
    %16 = arith.cmpi sge, %14, %15 : vector<256x128xi32>
    %c63_i32 = arith.constant 63 : i32
    %17 = vector.broadcast %c63_i32 : i32 to vector<256x128xi32>
    %18 = arith.cmpi slt, %14, %17 : vector<256x128xi32>
    %19 = arith.andi %16, %18 : vector<256x128xi1>
    %20 = arith.negf %13 : vector<256x128xf32>
    %21 = math.exp %20 : vector<256x128xf32>
    %cst_11 = arith.constant 1.000000e+00 : f32
    %22 = vector.broadcast %cst_11 : f32 to vector<256x128xf32>
    %23 = arith.addf %22, %21 : vector<256x128xf32>
    %24 = arith.divf %22, %23 : vector<256x128xf32>
    %25 = arith.select %19, %24, %13 : vector<256x128xi1>, vector<256x128xf32>
    %c0_12 = arith.constant 0 : index
    %c0_13 = arith.constant 0 : index
    %26 = vector.load %arg6[%c0_12, %c0_13] : memref<256x128xf32, #tpu.memory_space<vmem>>, vector<256x128xf32>
    tpu.vector_store %arg6[%c0_12, %c0_13], %25 {strides = array<i32>} : memref<256x128xf32, #tpu.memory_space<vmem>>, vector<256x128xf32>,
    return
  }
  func.func @transform_0(%arg0: i32) -> (i32, i32) {
    %c0_i32 = arith.constant 0 : i32
    %c0_i32_0 = arith.constant 0 : i32
    return %arg0, %c0_i32 : i32, i32
  }
  func.func @transform_1(%arg0: i32) -> (i32, i32) {
    %c0_i32 = arith.constant 0 : i32
    %c0_i32_0 = arith.constant 0 : i32
    %c0_i32_1 = arith.constant 0 : i32
    return %c0_i32, %c0_i32_0 : i32, i32
  }
  func.func @transform_2(%arg0: i32) -> (i32, i32) {
    %c0_i32 = arith.constant 0 : i32
    %c0_i32_0 = arith.constant 0 : i32
    %c0_i32_1 = arith.constant 0 : i32
    return %c0_i32, %c0_i32_0 : i32, i32
  }
  func.func @transform_3(%arg0: i32) -> (i32, i32) {
    %c0_i32 = arith.constant 0 : i32
    %c0_i32_0 = arith.constant 0 : i32
    %c0_i32_1 = arith.constant 0 : i32
    return %c0_i32, %c0_i32_0 : i32, i32
  }
  func.func @transform_4(%arg0: i32) -> (i32, i32) {
    %c0_i32 = arith.constant 0 : i32
    %c0_i32_0 = arith.constant 0 : i32
    %c0_i32_1 = arith.constant 0 : i32
    return %c0_i32, %c0_i32_0 : i32, i32
  }
  func.func @transform_5(%arg0: i32) -> (i32, i32) {
    %c0_i32 = arith.constant 0 : i32
    %c0_i32_0 = arith.constant 0 : i32
    return %arg0, %c0_i32 : i32, i32
  }
}

</mosaic_0001>

<bundles_post_ra>
// kernel: tpu_custom_call.1
= control target key start
LH: loop header
LB: loop body
LE: loop exit
PB: predicated region body
PF: predicated region fallthrough
CT: control target
= control target key end

     0   :  { %10 = vsyncpa [#allocation3], 0  ;;  %s3329_s0 = inlined_call_operand.vmem [shape: bf16[512,288], index: 0, kind: input, shape index: {}]   ;;  %s3330_s1 = inlined_call_operand.vmem [shape: bf16[288,128], index: 1, kind: input, shape index: {}]   ;;  %s3331_s2 = inlined_call_operand.vmem [shape: f32[1,128], index: 2, kind: input, shape index: {}]   ;;  %s3332_s3 = inlined_call_operand.vmem [shape: bf16[128,128], index: 3, kind: input, shape index: {}]   ;;  %s3333_s4 = inlined_call_operand.vmem [shape: f32[1,128], index: 4, kind: input, shape index: {}]   ;;  %s3334_s5 = inlined_call_operand.hbm [shape: f32[512,128], index: 5, kind: output, shape index: {}]  }
   0x1   :  { %12 = vsyncpa [#allocation3 + $0x1], 0  ;;  %s2659_s18 = smov 0   ;;  %s2661_s19 = smov 0  }
   0x2   :  { %s2663_s20 = smov 0   ;;  %s2665_s21 = smov 0  }
   0x3 LB: > { %s2680_s22 = sadd.s32 4294967295, %s2625_s21   ;;  %s1958_s23 = sadd.s32 4294967294, %s2625_s21   ;;  %s2625_s21 = sphi %s2665_s21, %s3342_s21   ;;  %s2621_s20 = sphi %s2663_s20, %s3341_s20   ;;  %s2617_s19 = sphi %s2661_s19, %s3340_s19   ;;  %s2613_s18 = sphi %s2659_s18, %s3339_s18  }
   0x4   : > { %s2684_s24 = sadd.s32 1, %s2625_s21   ;;  %s135_s25 = sadd.s32 1, %s2621_s20 }
   0x5   : > { %s132_s26 = ssub.s32 %s2625_s21, %s2684_s24  ;;  %p145_p0 = scmp.ne.s32.totalorder %s2621_s20, %s2617_s19 }
   0x6   : > { %p133_p1 = scmp.eq.s32.totalorder %s132_s26, 0  ;;  %p146_p2 = scmp.eq.s32.totalorder %s2680_s22, 1 }
   0x7   : > { %p151_p3 = scmp.ne.s32.totalorder %s2617_s19, %s2613_s18  ;;  %p152_p4 = scmp.eq.s32.totalorder %s1958_s23, 1 }
   0x8   : > { %s2695_s27 = scalar_select %p133_p1, %s2621_s20, %s135_s25  }
   0x9   : > { %p2697_p5 = por %p146_p2, %p145_p0  ;;  %p2701_p6 = por %p152_p4, %p151_p3 }
   0xa   : > { %p1961_p7 = scmp.ge.s32.totalorder %s2625_s21, 1  ;;  %p192_p8 = scmp.lt.s32.totalorder %s2625_s21, 3 }
   0xc   : > { %p193_p9 = pnand %p1961_p7, %p192_p8 }
   0xd   : > { %s1963_s9 = sshll.u32 (!%p193_p9), %s2680_s22, 5  ;;  %s218_s25 = sand.u32 (!%p193_p9), 1, %s2617_s19  }
   0xe   : > { %196 = sbr.rel (%p193_p9) target bundleno = 610 (0x262), region = 40  ;;  %p222_p10 = scmp.lt.s32.totalorder (!%p193_p9), %s1963_s9, 63 }
   0xf   : > { %s2388_s11 = sshll.u32 (!%p193_p9), %s2680_s22, 8  ;;  %s1881_s16 = scalar_lea.sflag (!%p193_p9), [#allocation3], %s218_s25 }
  0x10   : > { %s1892_s14 = scalar_lea.hbm (!%p193_p9), %s3334_s5, %s2388_s11  ;;  %s2583_s6 = scalar_lea.hbm (!%p193_p9), %s3334_s5, 512 }
  0x11   : > { %s1895_s15 = sshll.u32 (!%p193_p9), %s1892_s14, 4  ;;  %s1896_s15 = int_to_ptr.hbm [resolvable:$true] %s1895_s15 }
  0x12   : > { %s2577_s17 = sshra.s32 (!%p193_p9), %s1896_s15, 4  ;;  %s2578_s17 = int_to_ptr.hbm [resolvable:$true] %s2577_s17 }
  0x13   : > { %v2369_v0 = vld [vmem:[%s3330_s1 + $0x38] sm:$0xff]  ;;  %v2368_v2 = vld [vmem:[%s3330_s1 + $0x30] sm:$0xff]  ;;  %v2379_v4 = vld [vmem:[%s3330_s1 + $0x88] sm:$0xff]  ;;  %s3344_s9 = smov (!%p222_p10, %s1963_s9), 63  ;;  %vm682_vm0 = vcmask 261120   ;;  %p2584_p0 = scmp.lt.s32.totalorder %s2578_s17, %s3334_s5 }
  0x14   : > { %v2377_v1 = vld [vmem:[%s3330_s1 + $0x78] sm:$0xff]  ;;  %731 = vmatpush.bf16.msra.mxu0 %v2369_v0  ;;  %v2376_v3 = vld [vmem:[%s3330_s1 + $0x70] sm:$0xff]  ;;  %915 = vmatpush.bf16.msra.mxu2 %v2379_v4  ;;  %v2378_v5 = vld [vmem:[%s3330_s1 + $0x80] sm:$0xff]  ;;  %s2389_s26 = smul.u32 12, %s3344_s9 }
  0x15   : > { %820 = vmatpush.bf16.msra.mxu1 %v2377_v1  ;;  %v2367_v6 = vld [vmem:[%s3330_s1 + $0x28] sm:$0xff]  ;;  %v2366_v11 = vld [vmem:[%s3330_s1 + $0x20] sm:$0xff]  ;;  %v2365_v13 = vld [vmem:[%s3330_s1 + $0x18] sm:$0xff] }
  0x16   : > { %v2375_v7 = vld [vmem:[%s3330_s1 + $0x68] sm:$0xff]  ;;  %s2735_s10 = scalar_lea.vmem %s3329_s0, %s2389_s26  ;;  %v2374_v12 = vld [vmem:[%s3330_s1 + $0x60] sm:$0xff]  ;;  %v2373_v14 = vld [vmem:[%s3330_s1 + $0x58] sm:$0xff]  ;;  %s1962_s26 = sshll.u32 %s218_s25, 8 }
  0x17   : > { %v1975_v8 = vld [vmem:[%s2735_s10 + $0x8] sm:$0xf]  ;;  %v2316_v9 = vld [vmem:[%s2735_s10 + $0x10] sm:$0xf0]  ;;  %v1987_v17 = vld [vmem:[%s2735_s10 + $0x20] sm:$0xf] }
  0x18   : > { %732 = vmatpush.bf16.msra.mxu0 %v2368_v2  ;;  %916 = vmatpush.bf16.msra.mxu2 %v2378_v5  ;;  %v1976_v10 = vor.u32 %v2316_v9, %v1975_v8  ;;  %v2364_v15 = vld [vmem:[%s3330_s1 + $0x10] sm:$0xff]  ;;  %v2319_v18 = vld [vmem:[%s2735_s10 + $0x28] sm:$0xf0]  ;;  %v2362_v22 = vld [vmem:[%s3330_s1] sm:$0xff]  ;;  %s2974_s30 = scalar_lea.vmem [#allocation2], %s1962_s26 }
  0x19   : > { %821 = vmatpush.bf16.msra.mxu1 %v2376_v3  ;;  %v2372_v16 = vld [vmem:[%s3330_s1 + $0x50] sm:$0xff]  ;;  %v2363_v19 = vld [vmem:[%s3330_s1 + $0x8] sm:$0xff]  ;;  %v1988_v21 = vor.u32 %v2319_v18, %v1987_v17  ;;  %v2370_v23 = vld [vmem:[%s3330_s1 + $0x40] sm:$0xff]  ;;  %s1893_s22 = sshll.u32 %s2974_s30, 4  ;;  %s1894_s22 = int_to_ptr.vmem [resolvable:$true] %s1893_s22 }
  0x1a   : > { %v2371_v20 = vld [vmem:[%s3330_s1 + $0x48] sm:$0xff]  ;;  %v1967_v24 = vld [vmem:[%s2735_s10] sm:$0xf]  ;;  %v2314_v26 = vld [vmem:[%s2735_s10 + $0x4] sm:$0xf] }
  0x1b   : > { %2229 = vmatmul.msk.bf16.vlgmr.msra.gmra.mxu2 %vm682_vm0, %v1976_v10  ;;  %v2315_v25 = vld [vmem:[%s2735_s10 + $0x8] sm:$0xf0]  ;;  %v1969_v27 = vld [vmem:[%s2735_s10 + $0xc] sm:$0xf0]  ;;  %v1999_v30 = vld [vmem:[%s2735_s10 + $0x38] sm:$0xf] }
  0x1c   : > { %733 = vmatpush.bf16.msra.mxu0 %v2367_v6  ;;  %v1968_v28 = vor.u32 %v2315_v25, %v1967_v24  ;;  %v1972_v29 = vor.u32 %v2314_v26, %v1969_v27  ;;  %v2322_v31 = vld [vmem:[%s2735_s10 + $0x40] sm:$0xf0]  ;;  %v1979_v33 = vld [vmem:[%s2735_s10 + $0x18] sm:$0xf]  ;;  %v2317_v35 = vld [vmem:[%s2735_s10 + $0x1c] sm:$0xf] }
  0x1d   : > { %822 = vmatpush.bf16.msra.mxu1 %v2375_v7  ;;  %v2000_v32 = vor.u32 %v2322_v31, %v1999_v30  ;;  %v2318_v34 = vld [vmem:[%s2735_s10 + $0x20] sm:$0xf0]  ;;  %v1981_v36 = vld [vmem:[%s2735_s10 + $0x24] sm:$0xf0]  ;;  %v2011_v39 = vld [vmem:[%s2735_s10 + $0x50] sm:$0xf] }
  0x1e   : > { %v1980_v37 = vor.u32 %v2318_v34, %v1979_v33  ;;  %v1984_v38 = vor.u32 %v2317_v35, %v1981_v36  ;;  %v2325_v40 = vld [vmem:[%s2735_s10 + $0x58] sm:$0xf0]  ;;  %v1991_v42 = vld [vmem:[%s2735_s10 + $0x30] sm:$0xf]  ;;  %v2320_v44 = vld [vmem:[%s2735_s10 + $0x34] sm:$0xf] }
  0x1f   : > { %v2012_v41 = vor.u32 %v2325_v40, %v2011_v39  ;;  %v2321_v43 = vld [vmem:[%s2735_s10 + $0x38] sm:$0xf0]  ;;  %v1993_v45 = vld [vmem:[%s2735_s10 + $0x3c] sm:$0xf0]  ;;  %v2023_v48 = vld [vmem:[%s2735_s10 + $0x68] sm:$0xf] }
  0x20   : > { %734 = vmatpush.bf16.msra.mxu0 %v2366_v11  ;;  %v1992_v46 = vor.u32 %v2321_v43, %v1991_v42  ;;  %v1996_v47 = vor.u32 %v2320_v44, %v1993_v45  ;;  %v2328_v49 = vld [vmem:[%s2735_s10 + $0x70] sm:$0xf0]  ;;  %v2003_v51 = vld [vmem:[%s2735_s10 + $0x48] sm:$0xf]  ;;  %v2323_v53 = vld [vmem:[%s2735_s10 + $0x4c] sm:$0xf] }
  0x21   : > { %823 = vmatpush.bf16.msra.mxu1 %v2374_v12  ;;  %v2024_v50 = vor.u32 %v2328_v49, %v2023_v48  ;;  %v2324_v52 = vld [vmem:[%s2735_s10 + $0x50] sm:$0xf0]  ;;  %v2005_v54 = vld [vmem:[%s2735_s10 + $0x54] sm:$0xf0]  ;;  %v2035_v57 = vld [vmem:[%s2735_s10 + $0x80] sm:$0xf] }
  0x22   : > { %v2004_v55 = vor.u32 %v2324_v52, %v2003_v51  ;;  %v2008_v56 = vor.u32 %v2323_v53, %v2005_v54  ;;  %v2331_v58 = vld [vmem:[%s2735_s10 + $0x88] sm:$0xf0]  ;;  %v2015_v60 = vld [vmem:[%s2735_s10 + $0x60] sm:$0xf]  ;;  %v2326_v62 = vld [vmem:[%s2735_s10 + $0x64] sm:$0xf] }
  0x23   : > { %v2036_v59 = vor.u32 %v2331_v58, %v2035_v57  ;;  %v2327_v61 = vld [vmem:[%s2735_s10 + $0x68] sm:$0xf0]  ;;  %v2017_v63 = vld [vmem:[%s2735_s10 + $0x6c] sm:$0xf0]  ;;  %v2047_v2 = vld [vmem:[%s2735_s10 + $0x98] sm:$0xf] }
  0x24   : > { %735 = vmatpush.bf16.msra.mxu0 %v2365_v13  ;;  %v2016_v0 = vor.u32 %v2327_v61, %v2015_v60  ;;  %v2020_v1 = vor.u32 %v2326_v62, %v2017_v63  ;;  %v2334_v3 = vld [vmem:[%s2735_s10 + $0xa0] sm:$0xf0]  ;;  %v2027_v5 = vld [vmem:[%s2735_s10 + $0x78] sm:$0xf]  ;;  %v2329_v7 = vld [vmem:[%s2735_s10 + $0x7c] sm:$0xf] }
  0x25   : > { %824 = vmatpush.bf16.msra.mxu1 %v2373_v14  ;;  %v2048_v4 = vor.u32 %v2334_v3, %v2047_v2  ;;  %v2330_v6 = vld [vmem:[%s2735_s10 + $0x80] sm:$0xf0]  ;;  %v2029_v8 = vld [vmem:[%s2735_s10 + $0x84] sm:$0xf0]  ;;  %v2387_v11 = vld [vmem:[%s3332_s3 + $0x38] sm:$0xff] }
  0x26   : > { %v2028_v9 = vor.u32 %v2330_v6, %v2027_v5  ;;  %v2032_v10 = vor.u32 %v2329_v7, %v2029_v8  ;;  %1114 = vmatpush.bf16.msra.mxu3 %v2387_v11  ;;  %v2386_v12 = vld [vmem:[%s3332_s3 + $0x30] sm:$0xff]  ;;  %v2337_v14 = vld [vmem:[%s2735_s10 + $0xb8] sm:$0xf0]  ;;  %v2071_v25 = vld [vmem:[%s2735_s10 + $0xc8] sm:$0xf] }
  0x27   : > { %v2059_v13 = vld [vmem:[%s2735_s10 + $0xb0] sm:$0xf]  ;;  %v2333_v18 = vld [vmem:[%s2735_s10 + $0x98] sm:$0xf0]  ;;  %v2340_v26 = vld [vmem:[%s2735_s10 + $0xd0] sm:$0xf0] }
  0x28   : > { %736 = vmatpush.bf16.msra.mxu0 %v2364_v15  ;;  %v2385_v15 = vld [vmem:[%s3332_s3 + $0x28] sm:$0xff]  ;;  %v2039_v17 = vld [vmem:[%s2735_s10 + $0x90] sm:$0xf]  ;;  %v2383_v24 = vld [vmem:[%s3332_s3 + $0x18] sm:$0xff] }
  0x29   : > { %825 = vmatpush.bf16.msra.mxu1 %v2372_v16  ;;  %v2060_v16 = vor.u32 %v2337_v14, %v2059_v13  ;;  %v2382_v27 = vld [vmem:[%s3332_s3 + $0x10] sm:$0xff]  ;;  %v2051_v30 = vld [vmem:[%s2735_s10 + $0xa8] sm:$0xf]  ;;  %v2053_v33 = vld [vmem:[%s2735_s10 + $0xb4] sm:$0xf0] }
  0x2a   : > { %1115 = vmatpush.bf16.msra.mxu3 %v2386_v12  ;;  %v2336_v31 = vld [vmem:[%s2735_s10 + $0xb0] sm:$0xf0]  ;;  %v2380_v34 = vld [vmem:[%s3332_s3] sm:$0xff]  ;;  %v2343_v39 = vld [vmem:[%s2735_s10 + $0xe8] sm:$0xf0] }
  0x2b   : > { %2230 = vmatmul.msk.bf16.gmra.mxu2 %vm682_vm0, %v1988_v21  ;;  %v2384_v21 = vld [vmem:[%s3332_s3 + $0x20] sm:$0xff]  ;;  %v2052_v35 = vor.u32 %v2336_v31, %v2051_v30  ;;  %v2339_v43 = vld [vmem:[%s2735_s10 + $0xc8] sm:$0xf0]  ;;  %v2065_v45 = vld [vmem:[%s2735_s10 + $0xcc] sm:$0xf0] }
  0x2c   : > { %737 = vmatpush.bf16.msra.mxu0 %v2363_v19  ;;  %v2332_v19 = vld [vmem:[%s2735_s10 + $0x94] sm:$0xf]  ;;  %v2063_v42 = vld [vmem:[%s2735_s10 + $0xc0] sm:$0xf]  ;;  %v2338_v44 = vld [vmem:[%s2735_s10 + $0xc4] sm:$0xf] }
  0x2d   : > { %826 = vmatpush.bf16.msra.mxu1 %v2371_v20  ;;  %v2041_v20 = vld [vmem:[%s2735_s10 + $0x9c] sm:$0xf0]  ;;  %v2068_v48 = vor.u32 %v2338_v44, %v2065_v45  ;;  %v2095_v53 = vld [vmem:[%s2735_s10 + $0xf8] sm:$0xf]  ;;  %v2346_v54 = vld [vmem:[%s2735_s10 + $0x100] sm:$0xf0] }
  0x2e   : > { %1116 = vmatpush.bf16.msra.mxu3 %v2385_v15  ;;  %v2096_v60 = vor.u32 %v2346_v54, %v2095_v53  ;;  %v2075_v63 = vld [vmem:[%s2735_s10 + $0xd8] sm:$0xf]  ;;  %v2077_v2 = vld [vmem:[%s2735_s10 + $0xe4] sm:$0xf0]  ;;  %v2107_v13 = vld [vmem:[%s2735_s10 + $0x110] sm:$0xf] }
  0x2f   : > { %v2349_v14 = vld [vmem:[%s2735_s10 + $0x118] sm:$0xf0] }
  0x30   : > { %738 = vmatpush.bf16.msra.mxu0 %v2362_v22  ;;  %v2040_v22 = vor.u32 %v2333_v18, %v2039_v17 }
  0x31   : > { %827 = vmatpush.bf16.msra.mxu1 %v2370_v23  ;;  %v2044_v23 = vor.u32 %v2332_v19, %v2041_v20  ;;  %v2108_v20 = vor.u32 %v2349_v14, %v2107_v13 }
  0x32   : > { %1117 = vmatpush.bf16.msra.mxu3 %v2384_v21 }
  0x33   : > { %739 = vmatmul.bf16.vlgmr.msra.gmra.mxu0 %v1968_v28  ;;  %v2072_v28 = vor.u32 %v2340_v26, %v2071_v25  ;;  %v2344_v25 = vld [vmem:[%s2735_s10 + $0xf4] sm:$0xf]  ;;  %v2089_v26 = vld [vmem:[%s2735_s10 + $0xfc] sm:$0xf0] }
  0x34   : > { %828 = vmatmul.bf16.vlgmr.msra.gmra.mxu1 %v1972_v29  ;;  %v2381_v29 = vld [vmem:[%s3332_s3 + $0x8] sm:$0xff]  ;;  %v2092_v30 = vor.u32 %v2344_v25, %v2089_v26 }
  0x36   : > { %1118 = vmatpush.bf16.msra.mxu3 %v2383_v24  ;;  %v2345_v24 = vld [vmem:[%s2735_s10 + $0xf8] sm:$0xf0] }
  0x3a   : > { %1119 = vmatpush.bf16.msra.mxu3 %v2382_v27 }
  0x3b   : > { %2231 = vmatmul.msk.bf16.gmra.mxu2 %vm682_vm0, %v2000_v32  ;;  %v2335_v32 = vld [vmem:[%s2735_s10 + $0xac] sm:$0xf] }
  0x3c   : > { %v2056_v36 = vor.u32 %v2335_v32, %v2053_v33 }
  0x3e   : > { %1120 = vmatpush.bf16.msra.mxu3 %v2381_v29 }
  0x42   : > { %1121 = vmatpush.bf16.msra.mxu3 %v2380_v34 }
  0x43   : > { %744 = vmatmul.bf16.gmra.mxu0 %v1980_v37 }
  0x44   : > { %833 = vmatmul.bf16.gmra.mxu1 %v1984_v38  ;;  %v2083_v38 = vld [vmem:[%s2735_s10 + $0xe0] sm:$0xf] }
  0x4b   : > { %2232 = vmatmul.msk.bf16.gmra.mxu2 %vm682_vm0, %v2012_v41  ;;  %v2084_v41 = vor.u32 %v2343_v39, %v2083_v38  ;;  %v2352_v38 = vld [vmem:[%s2735_s10 + $0x130] sm:$0xf0] }
  0x53   : > { %749 = vmatmul.bf16.gmra.mxu0 %v1992_v46  ;;  %v2860_v46 = vld [vmem:[%s3331_s2] ss:$0 sm:$0xff] }
  0x54   : > { %838 = vmatmul.bf16.gmra.mxu1 %v1996_v47  ;;  %v2064_v47 = vor.u32 %v2339_v43, %v2063_v42 }
  0x5b   : > { %2233 = vmatmul.msk.bf16.gmra.mxu2 %vm682_vm0, %v2024_v50 }
  0x63   : > { %754 = vmatmul.bf16.gmra.mxu0 %v2004_v55 }
  0x64   : > { %843 = vmatmul.bf16.gmra.mxu1 %v2008_v56 }
  0x6b   : > { %2234 = vmatmul.msk.bf16.gmra.mxu2 %vm682_vm0, %v2036_v59 }
  0x73   : > { %759 = vmatmul.bf16.gmra.mxu0 %v2016_v0  ;;  %v2342_v0 = vld [vmem:[%s2735_s10 + $0xe0] sm:$0xf0] }
  0x74   : > { %848 = vmatmul.bf16.gmra.mxu1 %v2020_v1  ;;  %v2341_v1 = vld [vmem:[%s2735_s10 + $0xdc] sm:$0xf]  ;;  %v2076_v5 = vor.u32 %v2342_v0, %v2075_v63  ;;  %v2355_v63 = vld [vmem:[%s2735_s10 + $0x148] sm:$0xf0] }
  0x75   : > { %v2080_v6 = vor.u32 %v2341_v1, %v2077_v2 }
  0x7b   : > { %2235 = vmatmul.msk.bf16.gmra.mxu2 %vm682_vm0, %v2048_v4 }
  0x83   : > { %764 = vmatmul.bf16.gmra.mxu0 %v2028_v9 }
  0x84   : > { %853 = vmatmul.bf16.gmra.mxu1 %v2032_v10 }
  0x8b   : > { %2236 = vmatmul.msk.bf16.gmra.mxu2 %vm682_vm0, %v2060_v16 }
  0x93   : > { %769 = vmatmul.bf16.gmra.mxu0 %v2040_v22 }
  0x94   : > { %858 = vmatmul.bf16.gmra.mxu1 %v2044_v23  ;;  %v2087_v23 = vld [vmem:[%s2735_s10 + $0xf0] sm:$0xf] }
  0x95   : > { %v2088_v29 = vor.u32 %v2345_v24, %v2087_v23  ;;  %v2358_v23 = vld [vmem:[%s2735_s10 + $0x160] sm:$0xf0] }
  0x9b   : > { %2237 = vmatmul.msk.bf16.gmra.mxu2 %vm682_vm0, %v2072_v28 }
  0x9e   : > { %v918_v37 = vpop.f32.mrf.mxu2 }
  0xa3   : > { %774 = vmatmul.bf16.gmra.mxu0 %v2052_v35 }
  0xa4   : > { %863 = vmatmul.bf16.gmra.mxu1 %v2056_v36 }
  0xa6   : > { %v920_v40 = vpop.f32.mrf.mxu2 }
  0xab   : > { %2238 = vmatmul.msk.bf16.gmra.mxu2 %vm682_vm0, %v2084_v41 }
  0xae   : > { %v923_v51 = vpop.f32.mrf.mxu2 }
  0xb0   : > { %v740_v49 = vpop.f32.mrf.mxu0 }
  0xb1   : > { %v829_v50 = vpop.f32.mrf.mxu1  ;;  %v741_v52 = vadd.f32 %v2860_v46, %v740_v49  ;;  %v2348_v49 = vld [vmem:[%s2735_s10 + $0x110] sm:$0xf0] }
  0xb3   : > { %779 = vmatmul.bf16.gmra.mxu0 %v2064_v47  ;;  %v830_v55 = vadd.f32 %v829_v50, %v741_v52  ;;  %v2347_v50 = vld [vmem:[%s2735_s10 + $0x10c] sm:$0xf] }
  0xb4   : > { %868 = vmatmul.bf16.gmra.mxu1 %v2068_v48  ;;  %v2099_v48 = vld [vmem:[%s2735_s10 + $0x108] sm:$0xf] }
  0xb5   : > { %v919_v61 = vadd.f32 %v918_v37, %v830_v55  ;;  %v2119_v37 = vld [vmem:[%s2735_s10 + $0x128] sm:$0xf]  ;;  %v2100_v54 = vor.u32 %v2348_v49, %v2099_v48  ;;  %v2361_v48 = vld [vmem:[%s2735_s10 + $0x178] sm:$0xf0] }
  0xb6   : > { %v925_v59 = vpop.f32.mrf.mxu2  ;;  %v2120_v44 = vor.u32 %v2352_v38, %v2119_v37 }
  0xb7   : > { %v998_v4 = vmax.f32 %v919_v61, 0.0 }
  0xb8   : > { %v742_v56 = vpop.f32.mrf.mxu0 }
  0xb9   : > { %v831_v57 = vpop.f32.mrf.mxu1  ;;  %v743_v58 = vadd.f32 %v2860_v46, %v742_v56 }
  0xbb   : > { %v832_v62 = vadd.f32 %v831_v57, %v743_v58  ;;  %2239 = vmatmul.msk.bf16.gmra.mxu2 %vm682_vm0, %v2096_v60 }
  0xbd   : > { %v921_v3 = vadd.f32 %v920_v40, %v832_v62  ;;  %v2131_v62 = vld [vmem:[%s2735_s10 + $0x140] sm:$0xf] }
  0xbe   : > { %v928_v11 = vpop.f32.mrf.mxu2 }
  0xbf   : > { %v999_v7 = vmax.f32 %v921_v3, 0.0 }
  0xc0   : > { %v745_v8 = vpop.f32.mrf.mxu0 }
  0xc1   : > { %v834_v9 = vpop.f32.mrf.mxu1  ;;  %v1030_v10 = vpack.c.bf16 %v999_v7, %v998_v4  ;;  %v746_v12 = vadd.f32 %v2860_v46, %v745_v8  ;;  %v2111_v8 = vld [vmem:[%s2735_s10 + $0x120] sm:$0xf] }
  0xc3   : > { %784 = vmatmul.bf16.gmra.mxu0 %v2076_v5  ;;  %1122 = vmatmul.bf16.vlgmr.msra.gmra.mxu3 %v1030_v10  ;;  %v835_v15 = vadd.f32 %v834_v9, %v746_v12  ;;  %v2132_v5 = vor.u32 %v2355_v63, %v2131_v62  ;;  %v2351_v9 = vld [vmem:[%s2735_s10 + $0x128] sm:$0xf0]  ;;  %v2350_v10 = vld [vmem:[%s2735_s10 + $0x124] sm:$0xf] }
  0xc4   : > { %873 = vmatmul.bf16.gmra.mxu1 %v2080_v6  ;;  %v2112_v14 = vor.u32 %v2351_v9, %v2111_v8 }
  0xc5   : > { %v924_v21 = vadd.f32 %v923_v51, %v835_v15  ;;  %v2101_v51 = vld [vmem:[%s2735_s10 + $0x114] sm:$0xf0] }
  0xc6   : > { %v930_v19 = vpop.f32.mrf.mxu2  ;;  %v2104_v55 = vor.u32 %v2347_v50, %v2101_v51 }
  0xc7   : > { %v1000_v28 = vmax.f32 %v924_v21, 0.0 }
  0xc8   : > { %v747_v16 = vpop.f32.mrf.mxu0 }
  0xc9   : > { %v836_v17 = vpop.f32.mrf.mxu1  ;;  %v748_v18 = vadd.f32 %v2860_v46, %v747_v16 }
  0xcb   : > { %v837_v22 = vadd.f32 %v836_v17, %v748_v18  ;;  %2240 = vmatmul.msk.bf16.gmra.mxu2 %vm682_vm0, %v2108_v20 }
  0xcd   : > { %v926_v27 = vadd.f32 %v925_v59, %v837_v22  ;;  %v2143_v22 = vld [vmem:[%s2735_s10 + $0x158] sm:$0xf] }
  0xce   : > { %v933_v35 = vpop.f32.mrf.mxu2 }
  0xcf   : > { %v1001_v31 = vmax.f32 %v926_v27, 0.0 }
  0xd0   : > { %v750_v32 = vpop.f32.mrf.mxu0 }
  0xd1   : > { %v839_v33 = vpop.f32.mrf.mxu1  ;;  %v1031_v34 = vpack.c.bf16 %v1001_v31, %v1000_v28  ;;  %v751_v36 = vadd.f32 %v2860_v46, %v750_v32  ;;  %v2123_v32 = vld [vmem:[%s2735_s10 + $0x138] sm:$0xf] }
  0xd3   : > { %789 = vmatmul.bf16.gmra.mxu0 %v2088_v29  ;;  %1127 = vmatmul.bf16.gmra.mxu3 %v1031_v34  ;;  %v840_v39 = vadd.f32 %v839_v33, %v751_v36  ;;  %v2144_v29 = vor.u32 %v2358_v23, %v2143_v22  ;;  %v2354_v33 = vld [vmem:[%s2735_s10 + $0x140] sm:$0xf0]  ;;  %v2353_v34 = vld [vmem:[%s2735_s10 + $0x13c] sm:$0xf] }
  0xd4   : > { %878 = vmatmul.bf16.gmra.mxu1 %v2092_v30 }
  0xd5   : > { %v929_v45 = vadd.f32 %v928_v11, %v840_v39  ;;  %v2113_v11 = vld [vmem:[%s2735_s10 + $0x12c] sm:$0xf0]  ;;  %v2124_v39 = vor.u32 %v2354_v33, %v2123_v32 }
  0xd6   : > { %v935_v43 = vpop.f32.mrf.mxu2  ;;  %v2116_v15 = vor.u32 %v2350_v10, %v2113_v11 }
  0xd7   : > { %v1002_v53 = vmax.f32 %v929_v45, 0.0 }
  0xd8   : > { %v752_v40 = vpop.f32.mrf.mxu0 }
  0xd9   : > { %v841_v41 = vpop.f32.mrf.mxu1  ;;  %v753_v42 = vadd.f32 %v2860_v46, %v752_v40 }
  0xdb   : > { %v842_v47 = vadd.f32 %v841_v41, %v753_v42  ;;  %2241 = vmatmul.msk.bf16.gmra.mxu2 %vm682_vm0, %v2120_v44 }
  0xdd   : > { %v931_v52 = vadd.f32 %v930_v19, %v842_v47  ;;  %v2155_v47 = vld [vmem:[%s2735_s10 + $0x170] sm:$0xf] }
  0xde   : > { %v938_v60 = vpop.f32.mrf.mxu2 }
  0xdf   : > { %v1003_v56 = vmax.f32 %v931_v52, 0.0 }
  0xe0   : > { %v755_v57 = vpop.f32.mrf.mxu0 }
  0xe1   : > { %v844_v58 = vpop.f32.mrf.mxu1  ;;  %v1032_v59 = vpack.c.bf16 %v1003_v56, %v1002_v53  ;;  %v756_v61 = vadd.f32 %v2860_v46, %v755_v57  ;;  %v2135_v57 = vld [vmem:[%s2735_s10 + $0x150] sm:$0xf] }
  0xe3   : > { %794 = vmatmul.bf16.gmra.mxu0 %v2100_v54  ;;  %1132 = vmatmul.bf16.gmra.mxu3 %v1032_v59  ;;  %v845_v0 = vadd.f32 %v844_v58, %v756_v61  ;;  %v2156_v54 = vor.u32 %v2361_v48, %v2155_v47  ;;  %v2357_v58 = vld [vmem:[%s2735_s10 + $0x158] sm:$0xf0]  ;;  %v2356_v59 = vld [vmem:[%s2735_s10 + $0x154] sm:$0xf] }
  0xe4   : > { %883 = vmatmul.bf16.gmra.mxu1 %v2104_v55 }
  0xe5   : > { %v934_v6 = vadd.f32 %v933_v35, %v845_v0  ;;  %v2125_v35 = vld [vmem:[%s2735_s10 + $0x144] sm:$0xf0]  ;;  %v2136_v0 = vor.u32 %v2357_v58, %v2135_v57 }
  0xe6   : > { %v940_v4 = vpop.f32.mrf.mxu2  ;;  %v2128_v40 = vor.u32 %v2353_v34, %v2125_v35 }
  0xe7   : > { %v1004_v13 = vmax.f32 %v934_v6, 0.0 }
  0xe8   : > { %v757_v1 = vpop.f32.mrf.mxu0 }
  0xe9   : > { %v846_v2 = vpop.f32.mrf.mxu1  ;;  %v758_v3 = vadd.f32 %v2860_v46, %v757_v1 }
  0xeb   : > { %v847_v7 = vadd.f32 %v846_v2, %v758_v3  ;;  %2242 = vmatmul.msk.bf16.gmra.mxu2 %vm682_vm0, %v2132_v5 }
  0xed   : > { %v936_v12 = vadd.f32 %v935_v43, %v847_v7 }
  0xee   : > { %v943_v20 = vpop.f32.mrf.mxu2 }
  0xef   : > { %v1005_v16 = vmax.f32 %v936_v12, 0.0 }
  0xf0   : > { %v760_v17 = vpop.f32.mrf.mxu0 }
  0xf1   : > { %v849_v18 = vpop.f32.mrf.mxu1  ;;  %v1033_v19 = vpack.c.bf16 %v1005_v16, %v1004_v13  ;;  %v761_v21 = vadd.f32 %v2860_v46, %v760_v17  ;;  %v2359_v16 = vld [vmem:[%s2735_s10 + $0x16c] sm:$0xf]  ;;  %v2149_v17 = vld [vmem:[%s2735_s10 + $0x174] sm:$0xf0] }
  0xf2   : > { %v2152_v22 = vor.u32 %v2359_v16, %v2149_v17 }
  0xf3   : > { %799 = vmatmul.bf16.gmra.mxu0 %v2112_v14  ;;  %1137 = vmatmul.bf16.gmra.mxu3 %v1033_v19  ;;  %v850_v24 = vadd.f32 %v849_v18, %v761_v21  ;;  %v2147_v14 = vld [vmem:[%s2735_s10 + $0x168] sm:$0xf] }
  0xf4   : > { %888 = vmatmul.bf16.gmra.mxu1 %v2116_v15  ;;  %v2360_v15 = vld [vmem:[%s2735_s10 + $0x170] sm:$0xf0] }
  0xf5   : > { %v939_v30 = vadd.f32 %v938_v60, %v850_v24  ;;  %v2137_v60 = vld [vmem:[%s2735_s10 + $0x15c] sm:$0xf0]  ;;  %v2148_v21 = vor.u32 %v2360_v15, %v2147_v14  ;;  %s2579_s10 = scalar_lea.hbm %s2578_s17, 256 }
  0xf6   : > { %v945_v28 = vpop.f32.mrf.mxu2  ;;  %v2140_v1 = vor.u32 %v2356_v59, %v2137_v60  ;;  %v2930_v59 = vld [vmem:[%s3333_s4] ss:$0 sm:$0xff]  ;;  %p2580_p11 = scmp.ne.s32.totalorder %s2578_s17, %s2579_s10  ;;  %p2585_p1 = scmp.lt.s32.totalorder %s2583_s6, %s2579_s10 }
  0xf7   : > { %v1006_v37 = vmax.f32 %v939_v30, 0.0 }
  0xf8   : > { %v762_v25 = vpop.f32.mrf.mxu0  ;;  %p2581_p12 = pnand %p2580_p11, %p2697_p5  ;;  %p2586_p2 = por %p2585_p1, %p2584_p0 }
  0xf9   : > { %v851_v26 = vpop.f32.mrf.mxu1  ;;  %v763_v27 = vadd.f32 %v2860_v46, %v762_v25 }
  0xfa   : > { %p2582_p13 = pneg %p2581_p12 }
  0xfb   : > { %v852_v31 = vadd.f32 %v851_v26, %v763_v27  ;;  %2243 = vmatmul.msk.bf16.gmra.mxu2 %vm682_vm0, %v2144_v29 }
  0xfc   : > { %p2587_p3 = pnand %p2586_p2, %p2582_p13 }
  0xfd   : > { %v941_v36 = vadd.f32 %v940_v4, %v852_v31 }
  0xfe   : > { %v948_v44 = vpop.f32.mrf.mxu2 }
  0xff   : > { %v1007_v38 = vmax.f32 %v941_v36, 0.0 }
 0x100   : > { %v765_v41 = vpop.f32.mrf.mxu0 }
 0x101   : > { %v854_v42 = vpop.f32.mrf.mxu1  ;;  %v1034_v43 = vpack.c.bf16 %v1007_v38, %v1006_v37  ;;  %v766_v45 = vadd.f32 %v2860_v46, %v765_v41 }
 0x103   : > { %804 = vmatmul.bf16.gmra.mxu0 %v2124_v39  ;;  %1142 = vmatmul.bf16.gmra.mxu3 %v1034_v43  ;;  %v855_v49 = vadd.f32 %v854_v42, %v766_v45 }
 0x104   : > { %893 = vmatmul.bf16.gmra.mxu1 %v2128_v40 }
 0x105   : > { %v944_v55 = vadd.f32 %v943_v20, %v855_v49 }
 0x106   : > { %v950_v53 = vpop.f32.mrf.mxu2 }
 0x107   : > { %v1008_v62 = vmax.f32 %v944_v55, 0.0 }
 0x108   : > { %v767_v50 = vpop.f32.mrf.mxu0 }
 0x109   : > { %v856_v51 = vpop.f32.mrf.mxu1  ;;  %v768_v52 = vadd.f32 %v2860_v46, %v767_v50 }
 0x10b   : > { %v857_v56 = vadd.f32 %v856_v51, %v768_v52  ;;  %2244 = vmatmul.msk.bf16.gmra.mxu2 %vm682_vm0, %v2156_v54 }
 0x10d   : > { %v946_v61 = vadd.f32 %v945_v28, %v857_v56 }
 0x10e   : > { %v953_v5 = vpop.f32.mrf.mxu2 }
 0x10f   : > { %v1009_v63 = vmax.f32 %v946_v61, 0.0 }
 0x110   : > { %v770_v2 = vpop.f32.mrf.mxu0 }
 0x111   : > { %v859_v3 = vpop.f32.mrf.mxu1  ;;  %v1035_v4 = vpack.c.bf16 %v1009_v63, %v1008_v62  ;;  %v771_v6 = vadd.f32 %v2860_v46, %v770_v2 }
 0x113   : > { %809 = vmatmul.bf16.gmra.mxu0 %v2136_v0  ;;  %1147 = vmatmul.bf16.gmra.mxu3 %v1035_v4  ;;  %v860_v7 = vadd.f32 %v859_v3, %v771_v6 }
 0x114   : > { %898 = vmatmul.bf16.gmra.mxu1 %v2140_v1 }
 0x115   : > { %v949_v12 = vadd.f32 %v948_v44, %v860_v7 }
 0x116   : > { %v955_v11 = vpop.f32.mrf.mxu2 }
 0x117   : > { %v1010_v19 = vmax.f32 %v949_v12, 0.0 }
 0x118   : > { %v772_v8 = vpop.f32.mrf.mxu0 }
 0x119   : > { %v861_v9 = vpop.f32.mrf.mxu1  ;;  %v773_v10 = vadd.f32 %v2860_v46, %v772_v8 }
 0x11b   : > { %v862_v13 = vadd.f32 %v861_v9, %v773_v10 }
 0x11d   : > { %v951_v18 = vadd.f32 %v950_v53, %v862_v13 }
 0x11e   : > { %v958_v26 = vpop.f32.mrf.mxu2 }
 0x11f   : > { %v1011_v20 = vmax.f32 %v951_v18, 0.0 }
 0x120   : > { %v775_v23 = vpop.f32.mrf.mxu0 }
 0x121   : > { %v864_v24 = vpop.f32.mrf.mxu1  ;;  %v1036_v25 = vpack.c.bf16 %v1011_v20, %v1010_v19  ;;  %v776_v27 = vadd.f32 %v2860_v46, %v775_v23  ;;  %v1203_v19 = vlaneseq }
 0x123   : > { %814 = vmatmul.bf16.gmra.mxu0 %v2148_v21  ;;  %1152 = vmatmul.bf16.gmra.mxu3 %v1036_v25  ;;  %v865_v28 = vadd.f32 %v864_v24, %v776_v27  ;;  %v1204_v27 = vand.u32 127, %v1203_v19 }
 0x124   : > { %903 = vmatmul.bf16.gmra.mxu1 %v2152_v22 }
 0x125   : > { %v954_v33 = vadd.f32 %v953_v5, %v865_v28  ;;  %vm1205_vm1 = vcmp.ge.s32.totalorder %v1204_v27, 54  ;;  %vm1206_vm2 = vcmp.lt.s32.totalorder %v1204_v27, 63 }
 0x126   : > { %v960_v32 = vpop.f32.mrf.mxu2  ;;  %vm2961_vm4 = vmand %vm1205_vm1, %vm1206_vm2 }
 0x127   : > { %v1012_v36 = vmax.f32 %v954_v33, 0.0 }
 0x128   : > { %v777_v29 = vpop.f32.mrf.mxu0 }
 0x129   : > { %v866_v30 = vpop.f32.mrf.mxu1  ;;  %v778_v31 = vadd.f32 %v2860_v46, %v777_v29 }
 0x12b   : > { %v867_v34 = vadd.f32 %v866_v30, %v778_v31 }
 0x12d   : > { %v956_v35 = vadd.f32 %v955_v11, %v867_v34 }
 0x12e   : > { %v963_v41 = vpop.f32.mrf.mxu2 }
 0x12f   : > { %v1013_v37 = vmax.f32 %v956_v35, 0.0 }
 0x130   : > { %v780_v38 = vpop.f32.mrf.mxu0 }
 0x131   : > { %v869_v39 = vpop.f32.mrf.mxu1  ;;  %v1037_v40 = vpack.c.bf16 %v1013_v37, %v1012_v36  ;;  %v781_v42 = vadd.f32 %v2860_v46, %v780_v38 }
 0x133   : > { %1157 = vmatmul.bf16.gmra.mxu3 %v1037_v40  ;;  %v870_v43 = vadd.f32 %v869_v39, %v781_v42 }
 0x135   : > { %v959_v49 = vadd.f32 %v958_v26, %v870_v43 }
 0x136   : > { %v965_v48 = vpop.f32.mrf.mxu2 }
 0x137   : > { %v1014_v52 = vmax.f32 %v959_v49, 0.0 }
 0x138   : > { %v782_v44 = vpop.f32.mrf.mxu0 }
 0x139   : > { %v871_v45 = vpop.f32.mrf.mxu1  ;;  %v783_v47 = vadd.f32 %v2860_v46, %v782_v44 }
 0x13b   : > { %v872_v50 = vadd.f32 %v871_v45, %v783_v47 }
 0x13d   : > { %v961_v51 = vadd.f32 %v960_v32, %v872_v50 }
 0x13e   : > { %v968_v57 = vpop.f32.mrf.mxu2 }
 0x13f   : > { %v1015_v53 = vmax.f32 %v961_v51, 0.0 }
 0x140   : > { %v785_v54 = vpop.f32.mrf.mxu0 }
 0x141   : > { %v874_v55 = vpop.f32.mrf.mxu1  ;;  %v1038_v56 = vpack.c.bf16 %v1015_v53, %v1014_v52  ;;  %v786_v58 = vadd.f32 %v2860_v46, %v785_v54 }
 0x143   : > { %1162 = vmatmul.bf16.gmra.mxu3 %v1038_v56  ;;  %v875_v60 = vadd.f32 %v874_v55, %v786_v58 }
 0x145   : > { %v964_v4 = vadd.f32 %v963_v41, %v875_v60 }
 0x146   : > { %v1123_v61 = vpop.f32.mrf.mxu3  ;;  %v970_v2 = vpop.f32.mrf.mxu2 }
 0x147   : > { %v2933_v62 = vadd.f32 %v2930_v59, %v1123_v61  ;;  %v1016_v7 = vmax.f32 %v964_v4, 0.0 }
 0x148   : > { %v787_v63 = vpop.f32.mrf.mxu0 }
 0x149   : > { %v876_v0 = vpop.f32.mrf.mxu1  ;;  %v788_v1 = vadd.f32 %v2860_v46, %v787_v63  ;;  %v2277_v3 = vmul.f32 -1.442695, %v2933_v62 }
 0x14b   : > { %v877_v5 = vadd.f32 %v876_v0, %v788_v1  ;;  %2433 = vpow2.f32 %v2277_v3 }
 0x14d   : > { %v966_v6 = vadd.f32 %v965_v48, %v877_v5 }
 0x14e   : > { %v1125_v9 = vpop.f32.mrf.mxu3  ;;  %v2942_v18 = vpop.f32.mrf.mxu2 }
 0x14f   : > { %v1017_v8 = vmax.f32 %v966_v6, 0.0  ;;  %v2938_v10 = vadd.f32 %v2930_v59, %v1125_v9 }
 0x150   : > { %v790_v11 = vpop.f32.mrf.mxu0 }
 0x151   : > { %v879_v12 = vpop.f32.mrf.mxu1  ;;  %v1039_v13 = vpack.c.bf16 %v1017_v8, %v1016_v7  ;;  %v2434_v14 = vpop.eup %2433  ;;  %v2278_v15 = vmul.f32 -1.442695, %v2938_v10  ;;  %v791_v17 = vadd.f32 %v2860_v46, %v790_v11 }
 0x152   : > { %v1304_v16 = vadd.f32 1.0, %v2434_v14 }
 0x153   : > { %2435 = vpow2.f32 %v2278_v15  ;;  %1167 = vmatmul.bf16.gmra.mxu3 %v1039_v13  ;;  %v880_v20 = vadd.f32 %v879_v12, %v791_v17 }
 0x154   : > { %2437 = vrcp.f32 %v1304_v16  ;;  %v1345_v37 = vand.u32 2147483647, %v1304_v16  ;;  %v1347_v38 = vand.u32 2147483648, %v1304_v16  ;;  %vm1341_vm5 = vweird.f32 %v1304_v16 }
 0x155   : > { %v969_v31 = vadd.f32 %v968_v57, %v880_v20 }
 0x156   : > { %v1128_v21 = vpop.f32.mrf.mxu3  ;;  %v2952_v34 = vpop.f32.mrf.mxu2  ;;  %v1348_v53 = vor.u32 1.1754944e-38, %v1347_v38  ;;  %vm1346_vm7 = vcmp.eq.f32.partialorder %v1345_v37, 8.507059e+37 }
 0x157   : > { %v2945_v22 = vadd.f32 %v2930_v59, %v1128_v21  ;;  %v1018_v39 = vmax.f32 %v969_v31, 0.0 }
 0x158   : > { %v792_v23 = vpop.f32.mrf.mxu0 }
 0x159   : > { %v881_v24 = vpop.f32.mrf.mxu1  ;;  %v793_v25 = vadd.f32 %v2860_v46, %v792_v23  ;;  %v2436_v26 = vpop.eup %2435  ;;  %v2279_v28 = vmul.f32 -1.442695, %v2945_v22 }
 0x15a   : > { %v2438_v29 = vpop.eup %2437  ;;  %v2949_v30 = vadd.f32 1.0, %v2436_v26 }
 0x15b   : > { %v882_v32 = vadd.f32 %v881_v24, %v793_v25  ;;  %v1337_v33 = vmul.f32 %v2438_v29, %v1304_v16  ;;  %2439 = vpow2.f32 %v2279_v28  ;;  %vm1342_vm3 = vweird.f32 %v2438_v29 }
 0x15c   : > { %2441 = vrcp.f32 %v2949_v30  ;;  %vm1343_vm6 = vmor %vm1341_vm5, %vm1342_vm3  ;;  %v1362_v63 = vand.u32 2147483648, %v2949_v30  ;;  %v1360_v4 = vand.u32 2147483647, %v2949_v30  ;;  %vm1356_vm9 = vweird.f32 %v2949_v30 }
 0x15d   : > { %v1338_v35 = vsub.f32 1.0, %v1337_v33  ;;  %v971_v36 = vadd.f32 %v970_v2, %v882_v32 }
 0x15e   : > { %v1130_v40 = vpop.f32.mrf.mxu3  ;;  %v2978_v2 = vpop.f32.mrf.mxu2  ;;  %v1363_v13 = vor.u32 1.1754944e-38, %v1362_v63  ;;  %vm1361_vm11 = vcmp.eq.f32.partialorder %v1360_v4, 8.507059e+37 }
 0x15f   : > { %v1339_v41 = vmul.f32 %v2438_v29, %v1338_v35  ;;  %v1019_v42 = vmax.f32 %v971_v36, 0.0  ;;  %v2956_v43 = vadd.f32 %v2930_v59, %v1130_v40 }
 0x160   : > { %v795_v44 = vpop.f32.mrf.mxu0 }
 0x161   : > { %v884_v45 = vpop.f32.mrf.mxu1  ;;  %v2440_v47 = vpop.eup %2439  ;;  %v1340_v49 = vadd.f32 %v2438_v29, %v1339_v41  ;;  %v2280_v50 = vmul.f32 -1.442695, %v2956_v43  ;;  %v1040_v51 = vpack.c.bf16 %v1019_v42, %v1018_v39  ;;  %v796_v55 = vadd.f32 %v2860_v46, %v795_v44 }
 0x162   : > { %v2442_v52 = vpop.eup %2441  ;;  %v2966_v54 = vadd.f32 1.0, %v2440_v47 }
 0x163   : > { %v1344_v56 = vsel %vm1343_vm6, %v2438_v29, %v1340_v49  ;;  %v1352_v57 = vmul.f32 %v2442_v52, %v2949_v30  ;;  %2443 = vpow2.f32 %v2280_v50  ;;  %1172 = vmatmul.bf16.gmra.mxu3 %v1040_v51  ;;  %v885_v0 = vadd.f32 %v884_v45, %v796_v55 }
 0x164   : > { %v1349_v58 = vsel %vm1346_vm7, %v1348_v53, %v1344_v56  ;;  %2445 = vrcp.f32 %v2966_v54  ;;  %vm1357_vm8 = vweird.f32 %v2442_v52  ;;  %v1375_v25 = vand.u32 2147483647, %v2966_v54 }
 0x165   : > { %v1816_v60 = vsel %vm2961_vm4, %v1349_v58, %v2933_v62  ;;  %v1353_v61 = vsub.f32 1.0, %v1352_v57  ;;  %vm1358_vm10 = vmor %vm1356_vm9, %vm1357_vm8  ;;  %v974_v15 = vadd.f32 %v2942_v18, %v885_v0  ;;  %v1377_v18 = vand.u32 2147483648, %v2966_v54 }
 0x166   : > { %1848 = vst [vmem:[%s2974_s30] sm:$0xff] %v1816_v60  ;;  %v1133_v1 = vpop.f32.mrf.mxu3  ;;  %v980_v33 = vpop.f32.mrf.mxu2  ;;  %vm1371_vm13 = vweird.f32 %v2966_v54  ;;  %vm1376_vm15 = vcmp.eq.f32.partialorder %v1375_v25, 8.507059e+37 }
 0x167   : > { %v1354_v3 = vmul.f32 %v2442_v52, %v1353_v61  ;;  %v2982_v5 = vadd.f32 %v2930_v59, %v1133_v1  ;;  %v1020_v26 = vmax.f32 %v974_v15, 0.0  ;;  %v1378_v38 = vor.u32 1.1754944e-38, %v1377_v18 }
 0x168   : > { %v797_v6 = vpop.f32.mrf.mxu0 }
 0x169   : > { %v886_v62 = vpop.f32.mrf.mxu1  ;;  %v798_v7 = vadd.f32 %v2860_v46, %v797_v6  ;;  %v2444_v8 = vpop.eup %2443  ;;  %v1355_v9 = vadd.f32 %v2442_v52, %v1354_v3  ;;  %v2281_v11 = vmul.f32 -1.442695, %v2982_v5 }
 0x16a   : > { %v2446_v12 = vpop.eup %2445  ;;  %v2987_v14 = vadd.f32 1.0, %v2444_v8 }
 0x16b   : > { %v887_v16 = vadd.f32 %v886_v62, %v798_v7  ;;  %v1359_v17 = vsel %vm1358_vm10, %v2442_v52, %v1355_v9  ;;  %v1367_v19 = vmul.f32 %v2446_v12, %v2966_v54  ;;  %2447 = vpow2.f32 %v2281_v11 }
 0x16c   : > { %v1364_v20 = vsel %vm1361_vm11, %v1363_v13, %v1359_v17  ;;  %2449 = vrcp.f32 %v2987_v14  ;;  %vm1372_vm12 = vweird.f32 %v2446_v12  ;;  %v1392_v49 = vand.u32 2147483648, %v2987_v14 }
 0x16d   : > { %v1817_v21 = vsel %vm2961_vm4, %v1364_v20, %v2938_v10  ;;  %v1368_v23 = vsub.f32 1.0, %v1367_v19  ;;  %v976_v24 = vadd.f32 %v2952_v34, %v887_v16  ;;  %vm1373_vm14 = vmor %vm1371_vm13, %vm1372_vm12  ;;  %v1390_v53 = vand.u32 2147483647, %v2987_v14 }
 0x16e   : > { %1849 = vst [vmem:[%s2974_s30 + $0x8] sm:$0xff] %v1817_v21  ;;  %v1135_v27 = vpop.f32.mrf.mxu3  ;;  %vm1386_vm1 = vweird.f32 %v2987_v14  ;;  %v1393_v63 = vor.u32 1.1754944e-38, %v1392_v49  ;;  %v983_v4 = vpop.f32.mrf.mxu2 }
 0x16f   : > { %v1369_v28 = vmul.f32 %v2446_v12, %v1368_v23  ;;  %v1021_v29 = vmax.f32 %v976_v24, 0.0  ;;  %v3000_v30 = vadd.f32 %v2930_v59, %v1135_v27  ;;  %vm1391_vm3 = vcmp.eq.f32.partialorder %v1390_v53, 8.507059e+37 }
 0x170   : > { %v800_v31 = vpop.f32.mrf.mxu0 }
 0x171   : > { %v889_v32 = vpop.f32.mrf.mxu1  ;;  %v2448_v10 = vpop.eup %2447  ;;  %v1370_v35 = vadd.f32 %v2446_v12, %v1369_v28  ;;  %v2282_v34 = vmul.f32 -1.442695, %v3000_v30  ;;  %v1041_v36 = vpack.c.bf16 %v1021_v29, %v1020_v26  ;;  %v801_v40 = vadd.f32 %v2860_v46, %v800_v31 }
 0x172   : > { %v2450_v37 = vpop.eup %2449  ;;  %v3004_v39 = vadd.f32 1.0, %v2448_v10 }
 0x173   : > { %v1374_v41 = vsel %vm1373_vm14, %v2446_v12, %v1370_v35  ;;  %v1382_v42 = vmul.f32 %v2450_v37, %v2987_v14  ;;  %2451 = vpow2.f32 %v2282_v34  ;;  %1177 = vmatmul.bf16.gmra.mxu3 %v1041_v36  ;;  %v890_v50 = vadd.f32 %v889_v32, %v801_v40 }
 0x174   : > { %v1379_v44 = vsel %vm1376_vm15, %v1378_v38, %v1374_v41  ;;  %2453 = vrcp.f32 %v3004_v39  ;;  %vm1387_vm0 = vweird.f32 %v2450_v37  ;;  %v1405_v12 = vand.u32 2147483647, %v3004_v39 }
 0x175   : > { %v1818_v45 = vsel %vm2961_vm4, %v1379_v44, %v2945_v22  ;;  %v1383_v47 = vsub.f32 1.0, %v1382_v42  ;;  %vm1388_vm2 = vmor %vm1386_vm1, %vm1387_vm0  ;;  %v979_v1 = vadd.f32 %v2978_v2, %v890_v50  ;;  %v1407_v2 = vand.u32 2147483648, %v3004_v39 }
 0x176   : > { %1850 = vst [vmem:[%s2974_s30 + $0x10] sm:$0xff] %v1818_v45  ;;  %v1138_v51 = vpop.f32.mrf.mxu3  ;;  %vm1401_vm6 = vweird.f32 %v3004_v39  ;;  %vm1406_vm8 = vcmp.eq.f32.partialorder %v1405_v12, 8.507059e+37  ;;  %v985_v32 = vpop.f32.mrf.mxu2 }
 0x177   : > { %v1384_v52 = vmul.f32 %v2450_v37, %v1383_v47  ;;  %v3016_v54 = vadd.f32 %v2930_v59, %v1138_v51  ;;  %v1022_v13 = vmax.f32 %v979_v1, 0.0  ;;  %v1408_v18 = vor.u32 1.1754944e-38, %v1407_v2 }
 0x178   : > { %v802_v55 = vpop.f32.mrf.mxu0 }
 0x179   : > { %v891_v56 = vpop.f32.mrf.mxu1  ;;  %v803_v57 = vadd.f32 %v2860_v46, %v802_v55  ;;  %v2452_v58 = vpop.eup %2451  ;;  %v1385_v60 = vadd.f32 %v2450_v37, %v1384_v52  ;;  %v2283_v22 = vmul.f32 -1.442695, %v3016_v54 }
 0x17a   : > { %v2454_v61 = vpop.eup %2453  ;;  %v3021_v0 = vadd.f32 1.0, %v2452_v58 }
 0x17b   : > { %v892_v3 = vadd.f32 %v891_v56, %v803_v57  ;;  %v1389_v6 = vsel %vm1388_vm2, %v2450_v37, %v1385_v60  ;;  %v1397_v62 = vmul.f32 %v2454_v61, %v3004_v39  ;;  %2455 = vpow2.f32 %v2283_v22 }
 0x17c   : > { %v1394_v7 = vsel %vm1391_vm3, %v1393_v63, %v1389_v6  ;;  %2457 = vrcp.f32 %v3021_v0  ;;  %vm1402_vm5 = vweird.f32 %v2454_v61  ;;  %v1422_v35 = vand.u32 2147483648, %v3021_v0 }
 0x17d   : > { %v1819_v8 = vsel %vm2961_vm4, %v1394_v7, %v2956_v43  ;;  %v1398_v9 = vsub.f32 1.0, %v1397_v62  ;;  %v981_v11 = vadd.f32 %v980_v33, %v892_v3  ;;  %vm1403_vm7 = vmor %vm1401_vm6, %vm1402_vm5  ;;  %v1420_v38 = vand.u32 2147483647, %v3021_v0 }
 0x17e   : > { %1851 = vst [vmem:[%s2974_s30 + $0x18] sm:$0xff] %v1819_v8  ;;  %v1140_v14 = vpop.f32.mrf.mxu3  ;;  %vm1416_vm10 = vweird.f32 %v3021_v0  ;;  %v1423_v49 = vor.u32 1.1754944e-38, %v1422_v35 }
 0x17f   : > { %v1399_v15 = vmul.f32 %v2454_v61, %v1398_v9  ;;  %v1023_v16 = vmax.f32 %v981_v11, 0.0  ;;  %v3033_v17 = vadd.f32 %v2930_v59, %v1140_v14  ;;  %vm1421_vm12 = vcmp.eq.f32.partialorder %v1420_v38, 8.507059e+37 }
 0x180   : > { %v805_v19 = vpop.f32.mrf.mxu0 }
 0x181   : > { %v894_v20 = vpop.f32.mrf.mxu1  ;;  %v2456_v21 = vpop.eup %2455  ;;  %v1400_v23 = vadd.f32 %v2454_v61, %v1399_v15  ;;  %v2284_v43 = vmul.f32 -1.442695, %v3033_v17  ;;  %v1042_v24 = vpack.c.bf16 %v1023_v16, %v1022_v13  ;;  %v806_v27 = vadd.f32 %v2860_v46, %v805_v19 }
 0x182   : > { %v2458_v25 = vpop.eup %2457  ;;  %v3037_v26 = vadd.f32 1.0, %v2456_v21 }
 0x183   : > { %v1404_v28 = vsel %vm1403_vm7, %v2454_v61, %v1400_v23  ;;  %v1412_v29 = vmul.f32 %v2458_v25, %v3021_v0  ;;  %2459 = vpow2.f32 %v2284_v43  ;;  %1182 = vmatmul.bf16.gmra.mxu3 %v1042_v24  ;;  %v895_v34 = vadd.f32 %v894_v20, %v806_v27  ;;  %v988_v0 = vpop.f32.mrf.mxu2 }
 0x184   : > { %v1409_v31 = vsel %vm1406_vm8, %v1408_v18, %v1404_v28  ;;  %2461 = vrcp.f32 %v3037_v26  ;;  %vm1417_vm9 = vweird.f32 %v2458_v25  ;;  %v1435_v22 = vand.u32 2147483647, %v3037_v26 }
 0x185   : > { %v1820_v33 = vsel %vm2961_vm4, %v1409_v31, %v2982_v5  ;;  %v1413_v10 = vsub.f32 1.0, %v1412_v29  ;;  %vm1418_vm11 = vmor %vm1416_vm10, %vm1417_vm9  ;;  %v984_v51 = vadd.f32 %v983_v4, %v895_v34  ;;  %v1437_v61 = vand.u32 2147483648, %v3037_v26 }
 0x186   : > { %1852 = vst [vmem:[%s2974_s30 + $0x20] sm:$0xff] %v1820_v33  ;;  %v1143_v36 = vpop.f32.mrf.mxu3  ;;  %vm1431_vm14 = vweird.f32 %v3037_v26  ;;  %vm1436_vm0 = vcmp.eq.f32.partialorder %v1435_v22, 8.507059e+37 }
 0x187   : > { %v1414_v37 = vmul.f32 %v2458_v25, %v1413_v10  ;;  %v3049_v39 = vadd.f32 %v2930_v59, %v1143_v36  ;;  %v1024_v63 = vmax.f32 %v984_v51, 0.0  ;;  %v1438_v2 = vor.u32 1.1754944e-38, %v1437_v61 }
 0x188   : > { %v807_v40 = vpop.f32.mrf.mxu0 }
 0x189   : > { %v896_v41 = vpop.f32.mrf.mxu1  ;;  %v808_v42 = vadd.f32 %v2860_v46, %v807_v40  ;;  %v2460_v44 = vpop.eup %2459  ;;  %v1415_v45 = vadd.f32 %v2458_v25, %v1414_v37  ;;  %v2285_v5 = vmul.f32 -1.442695, %v3049_v39 }
 0x18a   : > { %v2462_v47 = vpop.eup %2461  ;;  %v3054_v50 = vadd.f32 1.0, %v2460_v44 }
 0x18b   : > { %v897_v52 = vadd.f32 %v896_v41, %v808_v42  ;;  %v1419_v53 = vsel %vm1418_vm11, %v2458_v25, %v1415_v45  ;;  %v1427_v55 = vmul.f32 %v2462_v47, %v3037_v26  ;;  %2463 = vpow2.f32 %v2285_v5  ;;  %v990_v28 = vpop.f32.mrf.mxu2 }
 0x18c   : > { %v1424_v56 = vsel %vm1421_vm12, %v1423_v49, %v1419_v53  ;;  %2465 = vrcp.f32 %v3054_v50  ;;  %vm1432_vm13 = vweird.f32 %v2462_v47  ;;  %v1452_v23 = vand.u32 2147483648, %v3054_v50 }
 0x18d   : > { %v1821_v57 = vsel %vm2961_vm4, %v1424_v56, %v3000_v30  ;;  %v1428_v58 = vsub.f32 1.0, %v1427_v55  ;;  %v986_v60 = vadd.f32 %v985_v32, %v897_v52  ;;  %vm1433_vm15 = vmor %vm1431_vm14, %vm1432_vm13  ;;  %v1450_v25 = vand.u32 2147483647, %v3054_v50 }
 0x18e   : > { %1853 = vst [vmem:[%s2974_s30 + $0x28] sm:$0xff] %v1821_v57  ;;  %v1145_v1 = vpop.f32.mrf.mxu3  ;;  %vm1446_vm2 = vweird.f32 %v3054_v50  ;;  %v1453_v35 = vor.u32 1.1754944e-38, %v1452_v23 }
 0x18f   : > { %v1429_v3 = vmul.f32 %v2462_v47, %v1428_v58  ;;  %v1025_v4 = vmax.f32 %v986_v60, 0.0  ;;  %v3065_v6 = vadd.f32 %v2930_v59, %v1145_v1  ;;  %vm1451_vm5 = vcmp.eq.f32.partialorder %v1450_v25, 8.507059e+37 }
 0x190   : > { %v810_v62 = vpop.f32.mrf.mxu0 }
 0x191   : > { %v899_v7 = vpop.f32.mrf.mxu1  ;;  %v2464_v8 = vpop.eup %2463  ;;  %v1430_v30 = vadd.f32 %v2462_v47, %v1429_v3  ;;  %v2286_v9 = vmul.f32 -1.442695, %v3065_v6  ;;  %v1043_v11 = vpack.c.bf16 %v1025_v4, %v1024_v63  ;;  %v811_v14 = vadd.f32 %v2860_v46, %v810_v62 }
 0x192   : > { %v2466_v12 = vpop.eup %2465  ;;  %v3069_v13 = vadd.f32 1.0, %v2464_v8 }
 0x193   : > { %v1434_v15 = vsel %vm1433_vm15, %v2462_v47, %v1430_v30  ;;  %v1442_v16 = vmul.f32 %v2466_v12, %v3054_v50  ;;  %2467 = vpow2.f32 %v2286_v9  ;;  %1187 = vmatmul.bf16.gmra.mxu3 %v1043_v11  ;;  %v900_v43 = vadd.f32 %v899_v7, %v811_v14 }
 0x194   : > { %v1439_v19 = vsel %vm1436_vm0, %v1438_v2, %v1434_v15  ;;  %2469 = vrcp.f32 %v3069_v13  ;;  %vm1447_vm1 = vweird.f32 %v2466_v12  ;;  %v1465_v5 = vand.u32 2147483647, %v3069_v13 }
 0x195   : > { %v1822_v20 = vsel %vm2961_vm4, %v1439_v19, %v3016_v54  ;;  %v1443_v21 = vsub.f32 1.0, %v1442_v16  ;;  %v2561_v54 = vld [vmem:[%s3331_s2] ss:$0 sm:$0xff]  ;;  %vm1448_vm3 = vmor %vm1446_vm2, %vm1447_vm1  ;;  %v989_v36 = vadd.f32 %v988_v0, %v900_v43  ;;  %v1467_v47 = vand.u32 2147483648, %v3069_v13  ;;  %v993_v0 = vpop.f32.mrf.mxu2 }
 0x196   : > { %1854 = vst [vmem:[%s2974_s30 + $0x30] sm:$0xff] %v1822_v20  ;;  %v1148_v24 = vpop.f32.mrf.mxu3  ;;  %vm1461_vm7 = vweird.f32 %v3069_v13  ;;  %vm1466_vm9 = vcmp.eq.f32.partialorder %v1465_v5, 8.507059e+37 }
 0x197   : > { %v1444_v46 = vmul.f32 %v2466_v12, %v1443_v21  ;;  %v3081_v18 = vadd.f32 %v2930_v59, %v1148_v24  ;;  %v1026_v49 = vmax.f32 %v989_v36, 0.0  ;;  %v1468_v61 = vor.u32 1.1754944e-38, %v1467_v47 }
 0x198   : > { %v812_v26 = vpop.f32.mrf.mxu0 }
 0x199   : > { %v901_v27 = vpop.f32.mrf.mxu1  ;;  %v813_v29 = vadd.f32 %v2561_v54, %v812_v26  ;;  %v2468_v31 = vpop.eup %2467  ;;  %v1445_v32 = vadd.f32 %v2466_v12, %v1444_v46  ;;  %v2287_v33 = vmul.f32 -1.442695, %v3081_v18 }
 0x19a   : > { %v2470_v10 = vpop.eup %2469  ;;  %v3088_v34 = vadd.f32 1.0, %v2468_v31 }
 0x19b   : > { %v902_v37 = vadd.f32 %v901_v27, %v813_v29  ;;  %v1449_v38 = vsel %vm1448_vm3, %v2466_v12, %v1445_v32  ;;  %v1457_v40 = vmul.f32 %v2470_v10, %v3069_v13  ;;  %2471 = vpow2.f32 %v2287_v33 }
 0x19c   : > { %v1454_v41 = vsel %vm1451_vm5, %v1453_v35, %v1449_v38  ;;  %2473 = vrcp.f32 %v3088_v34  ;;  %vm1462_vm6 = vweird.f32 %v2470_v10  ;;  %v1482_v30 = vand.u32 2147483648, %v3088_v34 }
 0x19d   : > { %v1823_v42 = vsel %vm2961_vm4, %v1454_v41, %v3033_v17  ;;  %v1458_v44 = vsub.f32 1.0, %v1457_v40  ;;  %v991_v45 = vadd.f32 %v990_v28, %v902_v37  ;;  %vm1463_vm8 = vmor %vm1461_vm7, %vm1462_vm6  ;;  %v1480_v2 = vand.u32 2147483647, %v3088_v34  ;;  %v995_v28 = vpop.f32.mrf.mxu2 }
 0x19e   : > { %1855 = vst [vmem:[%s2974_s30 + $0x38] sm:$0xff] %v1823_v42  ;;  %v1150_v50 = vpop.f32.mrf.mxu3  ;;  %vm1476_vm11 = vweird.f32 %v3088_v34  ;;  %v1483_v23 = vor.u32 1.1754944e-38, %v1482_v30 }
 0x19f   : > { %v1459_v51 = vmul.f32 %v2470_v10, %v1458_v44  ;;  %v1027_v52 = vmax.f32 %v991_v45, 0.0  ;;  %v3099_v53 = vadd.f32 %v2930_v59, %v1150_v50  ;;  %vm1481_vm13 = vcmp.eq.f32.partialorder %v1480_v2, 8.507059e+37 }
 0x1a0   : > { %v815_v55 = vpop.f32.mrf.mxu0 }
 0x1a1   : > { %v904_v56 = vpop.f32.mrf.mxu1  ;;  %v2472_v57 = vpop.eup %2471  ;;  %v1460_v58 = vadd.f32 %v2470_v10, %v1459_v51  ;;  %v2288_v17 = vmul.f32 -1.442695, %v3099_v53  ;;  %v1044_v60 = vpack.c.bf16 %v1027_v52, %v1026_v49  ;;  %v816_v1 = vadd.f32 %v2561_v54, %v815_v55 }
 0x1a2   : > { %v2474_v22 = vpop.eup %2473  ;;  %v3103_v63 = vadd.f32 1.0, %v2472_v57 }
 0x1a3   : > { %v1464_v3 = vsel %vm1463_vm8, %v2470_v10, %v1460_v58  ;;  %v1472_v4 = vmul.f32 %v2474_v22, %v3088_v34  ;;  %2475 = vpow2.f32 %v2288_v17  ;;  %1192 = vmatmul.bf16.gmra.mxu3 %v1044_v60  ;;  %v905_v9 = vadd.f32 %v904_v56, %v816_v1 }
 0x1a4   : > { %v1469_v62 = vsel %vm1466_vm9, %v1468_v61, %v1464_v3  ;;  %2477 = vrcp.f32 %v3103_v63  ;;  %vm1477_vm10 = vweird.f32 %v2474_v22  ;;  %v1495_v32 = vand.u32 2147483647, %v3103_v63 }
 0x1a5   : > { %v1824_v7 = vsel %vm2961_vm4, %v1469_v62, %v3049_v39  ;;  %v1473_v8 = vsub.f32 1.0, %v1472_v4  ;;  %vm1478_vm12 = vmor %vm1476_vm11, %vm1477_vm10  ;;  %v994_v24 = vadd.f32 %v993_v0, %v905_v9  ;;  %v1497_v33 = vand.u32 2147483648, %v3103_v63 }
 0x1a6   : > { %1856 = vst [vmem:[%s2974_s30 + $0x40] sm:$0xff] %v1824_v7  ;;  %v1153_v11 = vpop.f32.mrf.mxu3  ;;  %vm1491_vm15 = vweird.f32 %v3103_v63  ;;  %vm1496_vm1 = vcmp.eq.f32.partialorder %v1495_v32, 8.507059e+37 }
 0x1a7   : > { %v1474_v12 = vmul.f32 %v2474_v22, %v1473_v8  ;;  %v3114_v13 = vadd.f32 %v2930_v59, %v1153_v11  ;;  %v1028_v10 = vmax.f32 %v994_v24, 0.0  ;;  %v1498_v44 = vor.u32 1.1754944e-38, %v1497_v33 }
 0x1a8   : > { %v817_v14 = vpop.f32.mrf.mxu0 }
 0x1a9   : > { %v818_v15 = vadd.f32 %v2561_v54, %v817_v14  ;;  %v2476_v16 = vpop.eup %2475  ;;  %v1475_v19 = vadd.f32 %v2474_v22, %v1474_v12  ;;  %v2289_v39 = vmul.f32 -1.442695, %v3114_v13  ;;  %v906_v20 = vpop.f32.mrf.mxu1 }
 0x1aa   : > { %v2478_v21 = vpop.eup %2477  ;;  %v1315_v43 = vadd.f32 1.0, %v2476_v16 }
 0x1ab   : > { %v907_v46 = vadd.f32 %v906_v20, %v818_v15  ;;  %v1479_v25 = vsel %vm1478_vm12, %v2474_v22, %v1475_v19  ;;  %v1487_v26 = vmul.f32 %v2478_v21, %v3103_v63  ;;  %2479 = vpow2.f32 %v2289_v39 }
 0x1ac   : > { %v1484_v27 = vsel %vm1481_vm13, %v1483_v23, %v1479_v25  ;;  %2481 = vrcp.f32 %v1315_v43  ;;  %vm1492_vm14 = vweird.f32 %v2478_v21  ;;  %v1512_v52 = vand.u32 2147483648, %v1315_v43 }
 0x1ad   : > { %v1825_v54 = vsel %vm2961_vm4, %v1484_v27, %v3065_v6  ;;  %v1488_v29 = vsub.f32 1.0, %v1487_v26  ;;  %v996_v31 = vadd.f32 %v995_v28, %v907_v46  ;;  %vm1493_vm0 = vmor %vm1491_vm15, %vm1492_vm14  ;;  %v1510_v57 = vand.u32 2147483647, %v1315_v43 }
 0x1ae   : > { %1857 = vst [vmem:[%s2974_s30 + $0x48] sm:$0xff] %v1825_v54  ;;  %v1155_v35 = vpop.f32.mrf.mxu3  ;;  %vm1506_vm3 = vweird.f32 %v1315_v43  ;;  %v1513_v63 = vor.u32 1.1754944e-38, %v1512_v52 }
 0x1af   : > { %v1489_v34 = vmul.f32 %v2478_v21, %v1488_v29  ;;  %v1029_v36 = vmax.f32 %v996_v31, 0.0  ;;  %v3126_v37 = vadd.f32 %v2930_v59, %v1155_v35  ;;  %vm1511_vm6 = vcmp.eq.f32.partialorder %v1510_v57, 8.507059e+37 }
 0x1b1   : > { %v2480_v38 = vpop.eup %2479  ;;  %v1490_v40 = vadd.f32 %v2478_v21, %v1489_v34  ;;  %v2290_v6 = vmul.f32 -1.442695, %v3126_v37  ;;  %v1045_v41 = vpack.c.bf16 %v1029_v36, %v1028_v10 }
 0x1b2   : > { %v2482_v42 = vpop.eup %2481  ;;  %v1316_v45 = vadd.f32 1.0, %v2480_v38 }
 0x1b3   : > { %v1494_v5 = vsel %vm1493_vm0, %v2478_v21, %v1490_v40  ;;  %v1502_v47 = vmul.f32 %v2482_v42, %v1315_v43  ;;  %2483 = vpow2.f32 %v2290_v6  ;;  %1197 = vmatmul.bf16.gmra.mxu3 %v1045_v41  ;;  %vm1507_vm2 = vweird.f32 %v2482_v42 }
 0x1b4   : > { %v1499_v49 = vsel %vm1496_vm1, %v1498_v44, %v1494_v5  ;;  %2485 = vrcp.f32 %v1316_v45  ;;  %vm1508_vm5 = vmor %vm1506_vm3, %vm1507_vm2  ;;  %v1527_v7 = vand.u32 2147483648, %v1316_v45  ;;  %v1525_v9 = vand.u32 2147483647, %v1316_v45 }
 0x1b5   : > { %v1826_v50 = vsel %vm2961_vm4, %v1499_v49, %v3081_v18  ;;  %v1503_v51 = vsub.f32 1.0, %v1502_v47  ;;  %vm1521_vm8 = vweird.f32 %v1316_v45 }
 0x1b6   : > { %1858 = vst [vmem:[%s2974_s30 + $0x50] sm:$0xff] %v1826_v50  ;;  %v1158_v55 = vpop.f32.mrf.mxu3  ;;  %v1528_v16 = vor.u32 1.1754944e-38, %v1527_v7  ;;  %vm1526_vm10 = vcmp.eq.f32.partialorder %v1525_v9, 8.507059e+37 }
 0x1b7   : > { %v1504_v56 = vmul.f32 %v2482_v42, %v1503_v51  ;;  %v3135_v58 = vadd.f32 %v2930_v59, %v1158_v55 }
 0x1b9   : > { %v2484_v17 = vpop.eup %2483  ;;  %v1505_v60 = vadd.f32 %v2482_v42, %v1504_v56  ;;  %v2291_v22 = vmul.f32 -1.442695, %v3135_v58 }
 0x1ba   : > { %v2486_v61 = vpop.eup %2485  ;;  %v1317_v18 = vadd.f32 1.0, %v2484_v17 }
 0x1bb   : > { %v1509_v0 = vsel %vm1508_vm5, %v2482_v42, %v1505_v60  ;;  %v1517_v1 = vmul.f32 %v2486_v61, %v1316_v45  ;;  %2487 = vpow2.f32 %v2291_v22  ;;  %vm1522_vm7 = vweird.f32 %v2486_v61 }
 0x1bc   : > { %v1514_v3 = vsel %vm1511_vm6, %v1513_v63, %v1509_v0  ;;  %2489 = vrcp.f32 %v1317_v18  ;;  %vm1523_vm9 = vmor %vm1521_vm8, %vm1522_vm7  ;;  %v1542_v43 = vand.u32 2147483648, %v1317_v18  ;;  %v1540_v25 = vand.u32 2147483647, %v1317_v18 }
 0x1bd   : > { %v1827_v4 = vsel %vm2961_vm4, %v1514_v3, %v3099_v53  ;;  %v1518_v62 = vsub.f32 1.0, %v1517_v1  ;;  %vm1536_vm12 = vweird.f32 %v1317_v18 }
 0x1be   : > { %1859 = vst [vmem:[%s2974_s30 + $0x58] sm:$0xff] %v1827_v4  ;;  %v1160_v8 = vpop.f32.mrf.mxu3  ;;  %v1543_v31 = vor.u32 1.1754944e-38, %v1542_v43  ;;  %vm1541_vm14 = vcmp.eq.f32.partialorder %v1540_v25, 8.507059e+37 }
 0x1bf   : > { %v1519_v30 = vmul.f32 %v2486_v61, %v1518_v62  ;;  %v3143_v11 = vadd.f32 %v2930_v59, %v1160_v8 }
 0x1c1   : > { %v2488_v12 = vpop.eup %2487  ;;  %v1520_v2 = vadd.f32 %v2486_v61, %v1519_v30  ;;  %v2292_v14 = vmul.f32 -1.442695, %v3143_v11 }
 0x1c2   : > { %v2490_v15 = vpop.eup %2489  ;;  %v1318_v53 = vadd.f32 1.0, %v2488_v12 }
 0x1c3   : > { %v1524_v19 = vsel %vm1523_vm9, %v2486_v61, %v1520_v2  ;;  %v1532_v39 = vmul.f32 %v2490_v15, %v1317_v18  ;;  %2491 = vpow2.f32 %v2292_v14  ;;  %vm1537_vm11 = vweird.f32 %v2490_v15 }
 0x1c4   : > { %v1529_v20 = vsel %vm1526_vm10, %v1528_v16, %v1524_v19  ;;  %2493 = vrcp.f32 %v1318_v53  ;;  %vm1538_vm13 = vmor %vm1536_vm12, %vm1537_vm11  ;;  %v1557_v36 = vand.u32 2147483648, %v1318_v53  ;;  %v1555_v6 = vand.u32 2147483647, %v1318_v53 }
 0x1c5   : > { %v1828_v21 = vsel %vm2961_vm4, %v1529_v20, %v3114_v13  ;;  %v1533_v23 = vsub.f32 1.0, %v1532_v39  ;;  %vm1551_vm0 = vweird.f32 %v1318_v53 }
 0x1c6   : > { %1860 = vst [vmem:[%s2974_s30 + $0x60] sm:$0xff] %v1828_v21  ;;  %v1163_v24 = vpop.f32.mrf.mxu3  ;;  %v1558_v47 = vor.u32 1.1754944e-38, %v1557_v36  ;;  %vm1556_vm2 = vcmp.eq.f32.partialorder %v1555_v6, 8.507059e+37 }
 0x1c7   : > { %v1534_v46 = vmul.f32 %v2490_v15, %v1533_v23  ;;  %v3151_v26 = vadd.f32 %v2930_v59, %v1163_v24 }
 0x1c9   : > { %v2492_v27 = vpop.eup %2491  ;;  %v1535_v28 = vadd.f32 %v2490_v15, %v1534_v46  ;;  %v2293_v54 = vmul.f32 -1.442695, %v3151_v26 }
 0x1ca   : > { %v2494_v29 = vpop.eup %2493  ;;  %v1319_v13 = vadd.f32 1.0, %v2492_v27 }
 0x1cb   : > { %v1539_v32 = vsel %vm1538_vm13, %v2490_v15, %v1535_v28  ;;  %v1547_v33 = vmul.f32 %v2494_v29, %v1318_v53  ;;  %2495 = vpow2.f32 %v2293_v54  ;;  %vm1552_vm15 = vweird.f32 %v2494_v29  ;;  %v3185_v28 = vld [vmem:[%s3333_s4] ss:$0 sm:$0xff] }
 0x1cc   : > { %v1544_v10 = vsel %vm1541_vm14, %v1543_v31, %v1539_v32  ;;  %2497 = vrcp.f32 %v1319_v13  ;;  %vm1553_vm1 = vmor %vm1551_vm0, %vm1552_vm15  ;;  %v1572_v56 = vand.u32 2147483648, %v1319_v13  ;;  %v1570_v60 = vand.u32 2147483647, %v1319_v13 }
 0x1cd   : > { %v1829_v35 = vsel %vm2961_vm4, %v1544_v10, %v3126_v37  ;;  %v1548_v34 = vsub.f32 1.0, %v1547_v33  ;;  %vm1566_vm5 = vweird.f32 %v1319_v13 }
 0x1ce   : > { %1861 = vst [vmem:[%s2974_s30 + $0x68] sm:$0xff] %v1829_v35  ;;  %v1165_v38 = vpop.f32.mrf.mxu3  ;;  %v1573_v1 = vor.u32 1.1754944e-38, %v1572_v56  ;;  %vm1571_vm7 = vcmp.eq.f32.partialorder %v1570_v60, 8.507059e+37 }
 0x1cf   : > { %v1549_v40 = vmul.f32 %v2494_v29, %v1548_v34  ;;  %v3159_v41 = vadd.f32 %v2930_v59, %v1165_v38 }
 0x1d1   : > { %v2496_v42 = vpop.eup %2495  ;;  %v1550_v44 = vadd.f32 %v2494_v29, %v1549_v40  ;;  %v2294_v45 = vmul.f32 -1.442695, %v3159_v41 }
 0x1d2   : > { %v2498_v5 = vpop.eup %2497  ;;  %v1320_v37 = vadd.f32 1.0, %v2496_v42 }
 0x1d3   : > { %v1554_v49 = vsel %vm1553_vm1, %v2494_v29, %v1550_v44  ;;  %v1562_v50 = vmul.f32 %v2498_v5, %v1319_v13  ;;  %2499 = vpow2.f32 %v2294_v45  ;;  %vm1567_vm3 = vweird.f32 %v2498_v5 }
 0x1d4   : > { %v1559_v51 = vsel %vm1556_vm2, %v1558_v47, %v1554_v49  ;;  %2501 = vrcp.f32 %v1320_v37  ;;  %vm1568_vm6 = vmor %vm1566_vm5, %vm1567_vm3  ;;  %v1587_v30 = vand.u32 2147483648, %v1320_v37  ;;  %v1585_v2 = vand.u32 2147483647, %v1320_v37 }
 0x1d5   : > { %v1830_v52 = vsel %vm2961_vm4, %v1559_v51, %v3135_v58  ;;  %v1563_v55 = vsub.f32 1.0, %v1562_v50  ;;  %vm1581_vm9 = vweird.f32 %v1320_v37 }
 0x1d6   : > { %1862 = vst [vmem:[%s2974_s30 + $0x70] sm:$0xff] %v1830_v52  ;;  %v1168_v57 = vpop.f32.mrf.mxu3  ;;  %v1588_v39 = vor.u32 1.1754944e-38, %v1587_v30  ;;  %vm1586_vm11 = vcmp.eq.f32.partialorder %v1585_v2, 8.507059e+37 }
 0x1d7   : > { %v1564_v17 = vmul.f32 %v2498_v5, %v1563_v55  ;;  %v3167_v22 = vadd.f32 %v2930_v59, %v1168_v57 }
 0x1d9   : > { %v2500_v61 = vpop.eup %2499  ;;  %v1565_v63 = vadd.f32 %v2498_v5, %v1564_v17  ;;  %v2295_v18 = vmul.f32 -1.442695, %v3167_v22 }
 0x1da   : > { %v2502_v0 = vpop.eup %2501  ;;  %v1321_v58 = vadd.f32 1.0, %v2500_v61 }
 0x1db   : > { %v1569_v3 = vsel %vm1568_vm6, %v2498_v5, %v1565_v63  ;;  %v1577_v4 = vmul.f32 %v2502_v0, %v1320_v37  ;;  %2503 = vpow2.f32 %v2295_v18  ;;  %vm1582_vm8 = vweird.f32 %v2502_v0 }
 0x1dc   : > { %v1574_v62 = vsel %vm1571_vm7, %v1573_v1, %v1569_v3  ;;  %2505 = vrcp.f32 %v1321_v58  ;;  %vm1583_vm10 = vmor %vm1581_vm9, %vm1582_vm8  ;;  %v1602_v24 = vand.u32 2147483648, %v1321_v58  ;;  %v1600_v27 = vand.u32 2147483647, %v1321_v58 }
 0x1dd   : > { %v1831_v7 = vsel %vm2961_vm4, %v1574_v62, %v3143_v11  ;;  %v1578_v8 = vsub.f32 1.0, %v1577_v4  ;;  %vm1596_vm13 = vweird.f32 %v1321_v58 }
 0x1de   : > { %1863 = vst [vmem:[%s2974_s30 + $0x78] sm:$0xff] %v1831_v7  ;;  %v1170_v9 = vpop.f32.mrf.mxu3  ;;  %v1603_v32 = vor.u32 1.1754944e-38, %v1602_v24  ;;  %vm1601_vm15 = vcmp.eq.f32.partialorder %v1600_v27, 8.507059e+37 }
 0x1df   : > { %v1579_v12 = vmul.f32 %v2502_v0, %v1578_v8  ;;  %v3175_v14 = vadd.f32 %v2930_v59, %v1170_v9 }
 0x1e1   : > { %v2504_v15 = vpop.eup %2503  ;;  %v1580_v16 = vadd.f32 %v2502_v0, %v1579_v12  ;;  %v2296_v53 = vmul.f32 -1.442695, %v3175_v14 }
 0x1e2   : > { %v2506_v19 = vpop.eup %2505  ;;  %v1322_v11 = vadd.f32 1.0, %v2504_v15 }
 0x1e3   : > { %v1584_v20 = vsel %vm1583_vm10, %v2502_v0, %v1580_v16  ;;  %v1592_v21 = vmul.f32 %v2506_v19, %v1321_v58  ;;  %2507 = vpow2.f32 %v2296_v53  ;;  %vm1597_vm12 = vweird.f32 %v2506_v19 }
 0x1e4   : > { %v1589_v23 = vsel %vm1586_vm11, %v1588_v39, %v1584_v20  ;;  %2509 = vrcp.f32 %v1322_v11  ;;  %vm1598_vm14 = vmor %vm1596_vm13, %vm1597_vm12  ;;  %v1617_v40 = vand.u32 2147483648, %v1322_v11  ;;  %v1615_v44 = vand.u32 2147483647, %v1322_v11 }
 0x1e5   : > { %v1832_v59 = vsel %vm2961_vm4, %v1589_v23, %v3151_v26  ;;  %v1593_v43 = vsub.f32 1.0, %v1592_v21  ;;  %vm1611_vm1 = vweird.f32 %v1322_v11 }
 0x1e6   : > { %1864 = vst [vmem:[%s2974_s30 + $0x80] sm:$0xff] %v1832_v59  ;;  %v1173_v46 = vpop.f32.mrf.mxu3  ;;  %v1618_v50 = vor.u32 1.1754944e-38, %v1617_v40  ;;  %vm1616_vm3 = vcmp.eq.f32.partialorder %v1615_v44, 8.507059e+37 }
 0x1e7   : > { %v1594_v25 = vmul.f32 %v2506_v19, %v1593_v43  ;;  %v3188_v54 = vadd.f32 %v3185_v28, %v1173_v46 }
 0x1e9   : > { %v2508_v29 = vpop.eup %2507  ;;  %v1595_v31 = vadd.f32 %v2506_v19, %v1594_v25  ;;  %v2297_v26 = vmul.f32 -1.442695, %v3188_v54 }
 0x1ea   : > { %v2510_v13 = vpop.eup %2509  ;;  %v1323_v33 = vadd.f32 1.0, %v2508_v29 }
 0x1eb   : > { %v1599_v10 = vsel %vm1598_vm14, %v2506_v19, %v1595_v31  ;;  %v1607_v35 = vmul.f32 %v2510_v13, %v1322_v11  ;;  %2511 = vpow2.f32 %v2297_v26  ;;  %vm1612_vm0 = vweird.f32 %v2510_v13 }
 0x1ec   : > { %v1604_v34 = vsel %vm1601_vm15, %v1603_v32, %v1599_v10  ;;  %2513 = vrcp.f32 %v1323_v33  ;;  %vm1613_vm2 = vmor %vm1611_vm1, %vm1612_vm0  ;;  %v1632_v17 = vand.u32 2147483648, %v1323_v33  ;;  %v1630_v63 = vand.u32 2147483647, %v1323_v33 }
 0x1ed   : > { %v1833_v36 = vsel %vm2961_vm4, %v1604_v34, %v3159_v41  ;;  %v1608_v38 = vsub.f32 1.0, %v1607_v35  ;;  %vm1626_vm6 = vweird.f32 %v1323_v33 }
 0x1ee   : > { %1865 = vst [vmem:[%s2974_s30 + $0x88] sm:$0xff] %v1833_v36  ;;  %v1175_v6 = vpop.f32.mrf.mxu3  ;;  %v1633_v4 = vor.u32 1.1754944e-38, %v1632_v17  ;;  %vm1631_vm8 = vcmp.eq.f32.partialorder %v1630_v63, 8.507059e+37 }
 0x1ef   : > { %v1609_v42 = vmul.f32 %v2510_v13, %v1608_v38  ;;  %v3196_v45 = vadd.f32 %v3185_v28, %v1175_v6 }
 0x1f1   : > { %v2512_v5 = vpop.eup %2511  ;;  %v1610_v47 = vadd.f32 %v2510_v13, %v1609_v42  ;;  %v2298_v37 = vmul.f32 -1.442695, %v3196_v45 }
 0x1f2   : > { %v2514_v49 = vpop.eup %2513  ;;  %v1324_v41 = vadd.f32 1.0, %v2512_v5 }
 0x1f3   : > { %v1614_v51 = vsel %vm1613_vm2, %v2510_v13, %v1610_v47  ;;  %v1622_v52 = vmul.f32 %v2514_v49, %v1323_v33  ;;  %2515 = vpow2.f32 %v2298_v37  ;;  %vm1627_vm5 = vweird.f32 %v2514_v49 }
 0x1f4   : > { %v1619_v55 = vsel %vm1616_vm3, %v1618_v50, %v1614_v51  ;;  %2517 = vrcp.f32 %v1324_v41  ;;  %vm1628_vm7 = vmor %vm1626_vm6, %vm1627_vm5  ;;  %v1647_v12 = vand.u32 2147483648, %v1324_v41  ;;  %v1645_v16 = vand.u32 2147483647, %v1324_v41 }
 0x1f5   : > { %v1834_v56 = vsel %vm2961_vm4, %v1619_v55, %v3167_v22  ;;  %v1623_v57 = vsub.f32 1.0, %v1622_v52  ;;  %vm1641_vm10 = vweird.f32 %v1324_v41 }
 0x1f6   : > { %1866 = vst [vmem:[%s2974_s30 + $0x90] sm:$0xff] %v1834_v56  ;;  %v1178_v60 = vpop.f32.mrf.mxu3  ;;  %v1648_v21 = vor.u32 1.1754944e-38, %v1647_v12  ;;  %vm1646_vm12 = vcmp.eq.f32.partialorder %v1645_v16, 8.507059e+37 }
 0x1f7   : > { %v1624_v61 = vmul.f32 %v2514_v49, %v1623_v57  ;;  %v3204_v18 = vadd.f32 %v3185_v28, %v1178_v60 }
 0x1f9   : > { %v2516_v0 = vpop.eup %2515  ;;  %v1625_v1 = vadd.f32 %v2514_v49, %v1624_v61  ;;  %v2299_v58 = vmul.f32 -1.442695, %v3204_v18 }
 0x1fa   : > { %v2518_v3 = vpop.eup %2517  ;;  %v1325_v22 = vadd.f32 1.0, %v2516_v0 }
 0x1fb   : > { %v1629_v62 = vsel %vm1628_vm7, %v2514_v49, %v1625_v1  ;;  %v1637_v7 = vmul.f32 %v2518_v3, %v1324_v41  ;;  %2519 = vpow2.f32 %v2299_v58  ;;  %vm1642_vm9 = vweird.f32 %v2518_v3 }
 0x1fc   : > { %v1634_v8 = vsel %vm1631_vm8, %v1633_v4, %v1629_v62  ;;  %2521 = vrcp.f32 %v1325_v22  ;;  %vm1643_vm11 = vmor %vm1641_vm10, %vm1642_vm9  ;;  %v1662_v25 = vand.u32 2147483648, %v1325_v22  ;;  %v1660_v31 = vand.u32 2147483647, %v1325_v22 }
 0x1fd   : > { %v1835_v30 = vsel %vm2961_vm4, %v1634_v8, %v3175_v14  ;;  %v1638_v9 = vsub.f32 1.0, %v1637_v7  ;;  %vm1656_vm14 = vweird.f32 %v1325_v22 }
 0x1fe   : > { %1867 = vst [vmem:[%s2974_s30 + $0x98] sm:$0xff] %v1835_v30  ;;  %v1180_v2 = vpop.f32.mrf.mxu3  ;;  %v1663_v35 = vor.u32 1.1754944e-38, %v1662_v25  ;;  %vm1661_vm0 = vcmp.eq.f32.partialorder %v1660_v31, 8.507059e+37 }
 0x1ff   : > { %v1639_v15 = vmul.f32 %v2518_v3, %v1638_v9  ;;  %v3212_v53 = vadd.f32 %v3185_v28, %v1180_v2 }
 0x201   : > { %v2520_v19 = vpop.eup %2519  ;;  %v1640_v39 = vadd.f32 %v2518_v3, %v1639_v15  ;;  %v2300_v11 = vmul.f32 -1.442695, %v3212_v53 }
 0x202   : > { %v2522_v20 = vpop.eup %2521  ;;  %v1326_v14 = vadd.f32 1.0, %v2520_v19 }
 0x203   : > { %v1644_v23 = vsel %vm1643_vm11, %v2518_v3, %v1640_v39  ;;  %v1652_v59 = vmul.f32 %v2522_v20, %v1325_v22  ;;  %2523 = vpow2.f32 %v2300_v11  ;;  %vm1657_vm13 = vweird.f32 %v2522_v20 }
 0x204   : > { %v1649_v43 = vsel %vm1646_vm12, %v1648_v21, %v1644_v23  ;;  %2525 = vrcp.f32 %v1326_v14  ;;  %vm1658_vm15 = vmor %vm1656_vm14, %vm1657_vm13  ;;  %v1677_v42 = vand.u32 2147483648, %v1326_v14  ;;  %v1675_v47 = vand.u32 2147483647, %v1326_v14 }
 0x205   : > { %v1836_v24 = vsel %vm2961_vm4, %v1649_v43, %v3188_v54  ;;  %v1653_v46 = vsub.f32 1.0, %v1652_v59  ;;  %vm1671_vm2 = vweird.f32 %v1326_v14 }
 0x206   : > { %1868 = vst [vmem:[%s2974_s30 + $0xa0] sm:$0xff] %v1836_v24  ;;  %v1183_v27 = vpop.f32.mrf.mxu3  ;;  %v1678_v52 = vor.u32 1.1754944e-38, %v1677_v42  ;;  %vm1676_vm5 = vcmp.eq.f32.partialorder %v1675_v47, 8.507059e+37 }
 0x207   : > { %v1654_v29 = vmul.f32 %v2522_v20, %v1653_v46  ;;  %v3220_v26 = vadd.f32 %v3185_v28, %v1183_v27 }
 0x209   : > { %v2524_v13 = vpop.eup %2523  ;;  %v1655_v32 = vadd.f32 %v2522_v20, %v1654_v29  ;;  %v2301_v33 = vmul.f32 -1.442695, %v3220_v26 }
 0x20a   : > { %v2526_v10 = vpop.eup %2525  ;;  %v1327_v54 = vadd.f32 1.0, %v2524_v13 }
 0x20b   : > { %v1659_v34 = vsel %vm1658_vm15, %v2522_v20, %v1655_v32  ;;  %v1667_v36 = vmul.f32 %v2526_v10, %v1326_v14  ;;  %2527 = vpow2.f32 %v2301_v33  ;;  %vm1672_vm1 = vweird.f32 %v2526_v10 }
 0x20c   : > { %v1664_v38 = vsel %vm1661_vm0, %v1663_v35, %v1659_v34  ;;  %2529 = vrcp.f32 %v1327_v54  ;;  %vm1673_vm3 = vmor %vm1671_vm2, %vm1672_vm1  ;;  %v1692_v61 = vand.u32 2147483648, %v1327_v54  ;;  %v1690_v1 = vand.u32 2147483647, %v1327_v54 }
 0x20d   : > { %v1837_v40 = vsel %vm2961_vm4, %v1664_v38, %v3196_v45  ;;  %v1668_v6 = vsub.f32 1.0, %v1667_v36  ;;  %vm1686_vm7 = vweird.f32 %v1327_v54 }
 0x20e   : > { %1869 = vst [vmem:[%s2974_s30 + $0xa8] sm:$0xff] %v1837_v40  ;;  %v1185_v44 = vpop.f32.mrf.mxu3  ;;  %v1693_v7 = vor.u32 1.1754944e-38, %v1692_v61  ;;  %vm1691_vm9 = vcmp.eq.f32.partialorder %v1690_v1, 8.507059e+37 }
 0x20f   : > { %v1669_v5 = vmul.f32 %v2526_v10, %v1668_v6  ;;  %v3228_v37 = vadd.f32 %v3185_v28, %v1185_v44 }
 0x211   : > { %v2528_v49 = vpop.eup %2527  ;;  %v1670_v50 = vadd.f32 %v2526_v10, %v1669_v5  ;;  %v2302_v41 = vmul.f32 -1.442695, %v3228_v37 }
 0x212   : > { %v2530_v51 = vpop.eup %2529  ;;  %v1328_v45 = vadd.f32 1.0, %v2528_v49 }
 0x213   : > { %v1674_v55 = vsel %vm1673_vm3, %v2526_v10, %v1670_v50  ;;  %v1682_v56 = vmul.f32 %v2530_v51, %v1327_v54  ;;  %2531 = vpow2.f32 %v2302_v41  ;;  %vm1687_vm6 = vweird.f32 %v2530_v51 }
 0x214   : > { %v1679_v57 = vsel %vm1676_vm5, %v1678_v52, %v1674_v55  ;;  %2533 = vrcp.f32 %v1328_v45  ;;  %vm1688_vm8 = vmor %vm1686_vm7, %vm1687_vm6  ;;  %v1707_v15 = vand.u32 2147483648, %v1328_v45  ;;  %v1705_v39 = vand.u32 2147483647, %v1328_v45 }
 0x215   : > { %v1838_v17 = vsel %vm2961_vm4, %v1679_v57, %v3204_v18  ;;  %v1683_v60 = vsub.f32 1.0, %v1682_v56  ;;  %vm1701_vm11 = vweird.f32 %v1328_v45 }
 0x216   : > { %1870 = vst [vmem:[%s2974_s30 + $0xb0] sm:$0xff] %v1838_v17  ;;  %v1188_v63 = vpop.f32.mrf.mxu3  ;;  %v1708_v59 = vor.u32 1.1754944e-38, %v1707_v15  ;;  %vm1706_vm13 = vcmp.eq.f32.partialorder %v1705_v39, 8.507059e+37 }
 0x217   : > { %v1684_v0 = vmul.f32 %v2530_v51, %v1683_v60  ;;  %v3236_v58 = vadd.f32 %v3185_v28, %v1188_v63 }
 0x219   : > { %v2532_v3 = vpop.eup %2531  ;;  %v1685_v4 = vadd.f32 %v2530_v51, %v1684_v0  ;;  %v2303_v22 = vmul.f32 -1.442695, %v3236_v58 }
 0x21a   : > { %v2534_v62 = vpop.eup %2533  ;;  %v1329_v18 = vadd.f32 1.0, %v2532_v3 }
 0x21b   : > { %v1689_v8 = vsel %vm1688_vm8, %v2530_v51, %v1685_v4  ;;  %v1697_v30 = vmul.f32 %v2534_v62, %v1328_v45  ;;  %2535 = vpow2.f32 %v2303_v22  ;;  %vm1702_vm10 = vweird.f32 %v2534_v62 }
 0x21c   : > { %v1694_v9 = vsel %vm1691_vm9, %v1693_v7, %v1689_v8  ;;  %2537 = vrcp.f32 %v1329_v18  ;;  %vm1703_vm12 = vmor %vm1701_vm11, %vm1702_vm10  ;;  %v1722_v29 = vand.u32 2147483648, %v1329_v18  ;;  %v1720_v32 = vand.u32 2147483647, %v1329_v18 }
 0x21d   : > { %v1839_v12 = vsel %vm2961_vm4, %v1694_v9, %v3212_v53  ;;  %v1698_v2 = vsub.f32 1.0, %v1697_v30  ;;  %vm1716_vm15 = vweird.f32 %v1329_v18 }
 0x21e   : > { %1871 = vst [vmem:[%s2974_s30 + $0xb8] sm:$0xff] %v1839_v12  ;;  %v1190_v16 = vpop.f32.mrf.mxu3  ;;  %v1723_v36 = vor.u32 1.1754944e-38, %v1722_v29  ;;  %vm1721_vm1 = vcmp.eq.f32.partialorder %v1720_v32, 8.507059e+37 }
 0x21f   : > { %v1699_v19 = vmul.f32 %v2534_v62, %v1698_v2  ;;  %v3244_v11 = vadd.f32 %v3185_v28, %v1190_v16 }
 0x221   : > { %v2536_v20 = vpop.eup %2535  ;;  %v1700_v21 = vadd.f32 %v2534_v62, %v1699_v19  ;;  %v2304_v14 = vmul.f32 -1.442695, %v3244_v11 }
 0x222   : > { %v2538_v23 = vpop.eup %2537  ;;  %v1330_v53 = vadd.f32 1.0, %v2536_v20 }
 0x223   : > { %v1704_v43 = vsel %vm1703_vm12, %v2534_v62, %v1700_v21  ;;  %v1712_v24 = vmul.f32 %v2538_v23, %v1329_v18  ;;  %2539 = vpow2.f32 %v2304_v14  ;;  %vm1717_vm14 = vweird.f32 %v2538_v23 }
 0x224   : > { %v1709_v46 = vsel %vm1706_vm13, %v1708_v59, %v1704_v43  ;;  %2541 = vrcp.f32 %v1330_v53  ;;  %vm1718_vm0 = vmor %vm1716_vm15, %vm1717_vm14  ;;  %v1737_v5 = vand.u32 2147483648, %v1330_v53  ;;  %v1735_v50 = vand.u32 2147483647, %v1330_v53 }
 0x225   : > { %v1840_v25 = vsel %vm2961_vm4, %v1709_v46, %v3220_v26  ;;  %v1713_v27 = vsub.f32 1.0, %v1712_v24  ;;  %vm1731_vm3 = vweird.f32 %v1330_v53 }
 0x226   : > { %1872 = vst [vmem:[%s2974_s30 + $0xc0] sm:$0xff] %v1840_v25  ;;  %v1193_v31 = vpop.f32.mrf.mxu3  ;;  %v1738_v56 = vor.u32 1.1754944e-38, %v1737_v5  ;;  %vm1736_vm6 = vcmp.eq.f32.partialorder %v1735_v50, 8.507059e+37 }
 0x227   : > { %v1714_v13 = vmul.f32 %v2538_v23, %v1713_v27  ;;  %v3252_v33 = vadd.f32 %v3185_v28, %v1193_v31 }
 0x229   : > { %v2540_v10 = vpop.eup %2539  ;;  %v1715_v35 = vadd.f32 %v2538_v23, %v1714_v13  ;;  %v2305_v54 = vmul.f32 -1.442695, %v3252_v33 }
 0x22a   : > { %v2542_v34 = vpop.eup %2541  ;;  %v1331_v26 = vadd.f32 1.0, %v2540_v10 }
 0x22b   : > { %v1719_v38 = vsel %vm1718_vm0, %v2538_v23, %v1715_v35  ;;  %v1727_v40 = vmul.f32 %v2542_v34, %v1330_v53  ;;  %2543 = vpow2.f32 %v2305_v54  ;;  %vm1732_vm2 = vweird.f32 %v2542_v34 }
 0x22c   : > { %v1724_v6 = vsel %vm1721_vm1, %v1723_v36, %v1719_v38  ;;  %2545 = vrcp.f32 %v1331_v26  ;;  %vm1733_vm5 = vmor %vm1731_vm3, %vm1732_vm2  ;;  %v1752_v0 = vand.u32 2147483648, %v1331_v26  ;;  %v1750_v4 = vand.u32 2147483647, %v1331_v26 }
 0x22d   : > { %v1841_v42 = vsel %vm2961_vm4, %v1724_v6, %v3228_v37  ;;  %v1728_v44 = vsub.f32 1.0, %v1727_v40  ;;  %vm1746_vm8 = vweird.f32 %v1331_v26 }
 0x22e   : > { %1873 = vst [vmem:[%s2974_s30 + $0xc8] sm:$0xff] %v1841_v42  ;;  %v1195_v47 = vpop.f32.mrf.mxu3  ;;  %v1753_v30 = vor.u32 1.1754944e-38, %v1752_v0  ;;  %vm1751_vm10 = vcmp.eq.f32.partialorder %v1750_v4, 8.507059e+37 }
 0x22f   : > { %v1729_v49 = vmul.f32 %v2542_v34, %v1728_v44  ;;  %v3260_v41 = vadd.f32 %v3185_v28, %v1195_v47 }
 0x231   : > { %v2544_v51 = vpop.eup %2543  ;;  %v1730_v52 = vadd.f32 %v2542_v34, %v1729_v49  ;;  %v2306_v45 = vmul.f32 -1.442695, %v3260_v41 }
 0x232   : > { %v2546_v55 = vpop.eup %2545  ;;  %v1332_v37 = vadd.f32 1.0, %v2544_v51 }
 0x233   : > { %v1734_v57 = vsel %vm1733_vm5, %v2542_v34, %v1730_v52  ;;  %v1742_v17 = vmul.f32 %v2546_v55, %v1331_v26  ;;  %2547 = vpow2.f32 %v2306_v45  ;;  %vm1747_vm7 = vweird.f32 %v2546_v55 }
 0x234   : > { %v1739_v60 = vsel %vm1736_vm6, %v1738_v56, %v1734_v57  ;;  %2549 = vrcp.f32 %v1332_v37  ;;  %vm1748_vm9 = vmor %vm1746_vm8, %vm1747_vm7  ;;  %v1767_v19 = vand.u32 2147483648, %v1332_v37  ;;  %v1765_v21 = vand.u32 2147483647, %v1332_v37 }
 0x235   : > { %v1842_v61 = vsel %vm2961_vm4, %v1739_v60, %v3236_v58  ;;  %v1743_v63 = vsub.f32 1.0, %v1742_v17  ;;  %vm1761_vm12 = vweird.f32 %v1332_v37 }
 0x236   : > { %1874 = vst [vmem:[%s2974_s30 + $0xd0] sm:$0xff] %v1842_v61  ;;  %v1198_v1 = vpop.f32.mrf.mxu3  ;;  %v1768_v24 = vor.u32 1.1754944e-38, %v1767_v19  ;;  %vm1766_vm14 = vcmp.eq.f32.partialorder %v1765_v21, 8.507059e+37 }
 0x237   : > { %v1744_v3 = vmul.f32 %v2546_v55, %v1743_v63  ;;  %v3268_v22 = vadd.f32 %v3185_v28, %v1198_v1 }
 0x239   : > { %v2548_v62 = vpop.eup %2547  ;;  %v1745_v7 = vadd.f32 %v2546_v55, %v1744_v3  ;;  %v2307_v18 = vmul.f32 -1.442695, %v3268_v22 }
 0x23a   : > { %v2550_v8 = vpop.eup %2549  ;;  %v1333_v58 = vadd.f32 1.0, %v2548_v62 }
 0x23b   : > { %v1749_v9 = vsel %vm1748_vm9, %v2546_v55, %v1745_v7  ;;  %v1757_v12 = vmul.f32 %v2550_v8, %v1332_v37  ;;  %2551 = vpow2.f32 %v2307_v18  ;;  %vm1762_vm11 = vweird.f32 %v2550_v8 }
 0x23c   : > { %v1754_v2 = vsel %vm1751_vm10, %v1753_v30, %v1749_v9  ;;  %2553 = vrcp.f32 %v1333_v58  ;;  %vm1763_vm13 = vmor %vm1761_vm12, %vm1762_vm11  ;;  %v1782_v31 = vand.u32 2147483648, %v1333_v58  ;;  %v1780_v32 = vand.u32 2147483647, %v1333_v58 }
 0x23d   : > { %v1843_v15 = vsel %vm2961_vm4, %v1754_v2, %v3244_v11  ;;  %v1758_v16 = vsub.f32 1.0, %v1757_v12  ;;  %vm1776_vm0 = vweird.f32 %v1333_v58 }
 0x23e   : > { %1875 = vst [vmem:[%s2974_s30 + $0xd8] sm:$0xff] %v1843_v15  ;;  %v1200_v39 = vpop.f32.mrf.mxu3  ;;  %v1783_v34 = vor.u32 1.1754944e-38, %v1782_v31  ;;  %vm1781_vm2 = vcmp.eq.f32.partialorder %v1780_v32, 8.507059e+37 }
 0x23f   : > { %v1759_v20 = vmul.f32 %v2550_v8, %v1758_v16  ;;  %v3276_v14 = vadd.f32 %v3185_v28, %v1200_v39 }
 0x241   : > { %v2552_v23 = vpop.eup %2551  ;;  %v1760_v59 = vadd.f32 %v2550_v8, %v1759_v20  ;;  %v2308_v53 = vmul.f32 -1.442695, %v3276_v14 }
 0x242   : > { %v2554_v43 = vpop.eup %2553  ;;  %v1334_v11 = vadd.f32 1.0, %v2552_v23 }
 0x243   : > { %v1764_v46 = vsel %vm1763_vm13, %v2550_v8, %v1760_v59  ;;  %v1772_v25 = vmul.f32 %v2554_v43, %v1333_v58  ;;  %2555 = vpow2.f32 %v2308_v53  ;;  %vm1777_vm15 = vweird.f32 %v2554_v43 }
 0x244   : > { %v1769_v27 = vsel %vm1766_vm14, %v1768_v24, %v1764_v46  ;;  %2557 = vrcp.f32 %v1334_v11  ;;  %vm1778_vm1 = vmor %vm1776_vm0, %vm1777_vm15  ;;  %v1797_v42 = vand.u32 2147483648, %v1334_v11  ;;  %v1795_v5 = vand.u32 2147483647, %v1334_v11 }
 0x245   : > { %v1844_v28 = vsel %vm2961_vm4, %v1769_v27, %v3252_v33  ;;  %v1773_v29 = vsub.f32 1.0, %v1772_v25  ;;  %vm1791_vm5 = vweird.f32 %v1334_v11 }
 0x246   : > { %1876 = vst [vmem:[%s2974_s30 + $0xe0] sm:$0xff] %v1844_v28  ;;  %v1798_v50 = vor.u32 1.1754944e-38, %v1797_v42  ;;  %vm1796_vm7 = vcmp.eq.f32.partialorder %v1795_v5, 8.507059e+37 }
 0x247   : > { %v1774_v13 = vmul.f32 %v2554_v43, %v1773_v29 }
 0x249   : > { %v2556_v10 = vpop.eup %2555  ;;  %v1775_v35 = vadd.f32 %v2554_v43, %v1774_v13 }
 0x24a   : > { %v2558_v54 = vpop.eup %2557  ;;  %v1335_v36 = vadd.f32 1.0, %v2556_v10 }
 0x24b   : > { %v1779_v26 = vsel %vm1778_vm1, %v2554_v43, %v1775_v35  ;;  %v1787_v38 = vmul.f32 %v2558_v54, %v1334_v11  ;;  %vm1792_vm3 = vweird.f32 %v2558_v54 }
 0x24c   : > { %v1784_v40 = vsel %vm1781_vm2, %v1783_v34, %v1779_v26  ;;  %2559 = vrcp.f32 %v1335_v36  ;;  %vm1793_vm6 = vmor %vm1791_vm5, %vm1792_vm3  ;;  %v1812_v56 = vand.u32 2147483648, %v1335_v36  ;;  %v1810_v57 = vand.u32 2147483647, %v1335_v36 }
 0x24d   : > { %v1845_v33 = vsel %vm2961_vm4, %v1784_v40, %v3260_v41  ;;  %v1788_v6 = vsub.f32 1.0, %v1787_v38  ;;  %vm1806_vm9 = vweird.f32 %v1335_v36 }
 0x24e   : > { %1877 = vst [vmem:[%s2974_s30 + $0xe8] sm:$0xff] %v1845_v33  ;;  %v1813_v60 = vor.u32 1.1754944e-38, %v1812_v56  ;;  %vm1811_vm11 = vcmp.eq.f32.partialorder %v1810_v57, 8.507059e+37 }
 0x24f   : > { %v1789_v44 = vmul.f32 %v2558_v54, %v1788_v6 }
 0x251   : > { %v1790_v47 = vadd.f32 %v2558_v54, %v1789_v44 }
 0x252   : > { %v2560_v49 = vpop.eup %2559 }
 0x253   : > { %v1794_v51 = vsel %vm1793_vm6, %v2558_v54, %v1790_v47  ;;  %v1802_v52 = vmul.f32 %v2560_v49, %v1335_v36  ;;  %vm1807_vm8 = vweird.f32 %v2560_v49 }
 0x254   : > { %v1799_v45 = vsel %vm1796_vm7, %v1798_v50, %v1794_v51  ;;  %vm1808_vm10 = vmor %vm1806_vm9, %vm1807_vm8 }
 0x255   : > { %v1846_v41 = vsel %vm2961_vm4, %v1799_v45, %v3268_v22  ;;  %v1803_v55 = vsub.f32 1.0, %v1802_v52 }
 0x256   : > { %1878 = vst [vmem:[%s2974_s30 + $0xf0] sm:$0xff] %v1846_v41 }
 0x257   : > { %v1804_v37 = vmul.f32 %v2560_v49, %v1803_v55 }
 0x259   : > { %v1805_v17 = vadd.f32 %v2560_v49, %v1804_v37 }
 0x25b   : > { %v1809_v61 = vsel %vm1808_vm10, %v2560_v49, %v1805_v17 }
 0x25c   : > { %v1814_v63 = vsel %vm1811_vm11, %v1813_v60, %v1809_v61 }
 0x25d   : > { %v1847_v0 = vsel %vm2961_vm4, %v1814_v63, %v3276_v14 }
 0x25e   : > { %1879 = vst [vmem:[%s2974_s30 + $0xf8] sm:$0xff] %v1847_v0 }
 0x25f   : > { %2590 = shalt.err (!%p2587_p3)
}
 0x260   : > { %s2627_s25 = smov 128   ;;  %s2628_s30 = smov 8  }
 0x261   : > { %2390 = dma.vmem_to_hbm [thread:$0]  (%p2697_p5), %s1894_s22, 4096, %s1896_s15, %s1881_s16, %s2627_s25, %s2627_s25, %s2628_s30  }
 0x262 PF: > { %p2396_p4 = scmp.ge.s32.totalorder %s2625_s21, 2  ;;  %s1910_s9 = sand.u32 1, %s2613_s18  }
 0x263   : > { %s1911_s11 = scalar_lea.sflag [#allocation3], %s1910_s9 }
 0x264   : > { %p2393_p7 = pnand %p2396_p4, %p2701_p6 }
 0x266   : > { %p2394_p8 = pneg %p2393_p7 }
 0x268   : > { %2608 = dma.done.wait (%p2394_p8), %s1911_s11, 4096  }
 0x269   : > { %2610 = vsyncadd (%p2394_p8), %s1911_s11, 4294963200  ;;  %p15_p9 = scmp.ge.s32.totalorder %s2684_s24, 4   ;;  %s3339_s18 = smov %s2617_s19 }
 0x26a   : > { %s3340_s19 = smov %s2621_s20  ;;  %s3341_s20 = smov %s2695_s27 }
 0x26b   : > { %s3342_s21 = smov %s2684_s24  ;;  %17 = sbr.rel (!%p15_p9) target bundleno = 3 (0x3), region = 75 }
 0x270   :  { %1917 = vsyncpa [#allocation3], 1 }
 0x271   :  { %1919 = vsyncpa [#allocation3 + $0x1], 1 }

</bundles_post_ra>
